<compile_context>
chip_gen: v7x
topology: tpu7x:2x2x1
jax: 0.10.0
libtpu: 0.0.40
codegen_flags: <defaults>
</compile_context>

<pallas_src>
import functools
import math

import jax
import jax.numpy as jnp
import numpy as np
from jax.experimental import pallas as pl
from jax.experimental.pallas import tpu as pltpu

EPS = 1e-5  # nn.LayerNorm default eps
_INV_SQRT2 = 1.0 / math.sqrt(2.0)


# --------------------------- Pallas kernels ---------------------------

def _layernorm_f32(x, g, b):
    mu = jnp.mean(x, axis=-1, keepdims=True)
    var = jnp.mean((x - mu) ** 2, axis=-1, keepdims=True)
    return (x - mu) * jax.lax.rsqrt(var + EPS) * g + b


def _gelu_exact(h):
    # exact (erf) GELU, matching torch.nn.GELU() default
    return 0.5 * h * (1.0 + jax.lax.erf(h * _INV_SQRT2))


def _ln_linear_kernel(x_ref, g_ref, b_ref, w_ref, wb_ref, o_ref):
    """out = LayerNorm(x) @ W + b   (fused LN + QKV projection, row tile)."""
    x = x_ref[...].astype(jnp.float32)
    y = _layernorm_f32(x, g_ref[...], b_ref[...])
    acc = jnp.dot(y, w_ref[...], preferred_element_type=jnp.float32)
    o_ref[...] = (acc + wb_ref[...]).astype(o_ref.dtype)


def _proj_res_ln_mlp_res_kernel(a_ref, wp_ref, bp_ref, r_ref, g_ref, b_ref,
                                w1_ref, b1_ref, w2_ref, b2_ref, o_ref):
    """x1 = res + a @ Wp + bp ;  out = x1 + MLP(LayerNorm(x1)).

    Fuses the attention output projection + residual add with the following
    LayerNorm + MLP + residual block — one kernel, no intermediate HBM round-trip.
    """
    a = a_ref[...].astype(jnp.float32)
    x1 = (r_ref[...].astype(jnp.float32)
          + jnp.dot(a, wp_ref[...], preferred_element_type=jnp.float32)
          + bp_ref[...])
    y = _layernorm_f32(x1, g_ref[...], b_ref[...])
    h = jnp.dot(y, w1_ref[...], preferred_element_type=jnp.float32) + b1_ref[...]
    h = _gelu_exact(h)
    out = x1 + jnp.dot(h, w2_ref[...], preferred_element_type=jnp.float32) + b2_ref[...]
    o_ref[...] = out.astype(o_ref.dtype)


def _attn_core(qkv, addend, o_ref, num_heads, scale):
    """Windowed MSA on a block of WB windows.

    qkv:    (WB, T, 3E) packed [q | k | v] along last dim.
    addend: (WB, T, T) float32 additive term — relative-position bias, with the
            shifted-window mask already folded in for the shifted variant.
    """
    wb, t, three_e = qkv.shape
    e = three_e // 3
    d = e // num_heads
    qkv = qkv.astype(jnp.float32)
    q_all = qkv[:, :, :e] * scale                  # fold 1/sqrt(D) into q (one VPU pass)
    k_all = qkv[:, :, e:2 * e]
    v_all = qkv[:, :, 2 * e:]
    head_outs = []
    for h in range(num_heads):
        q = q_all[:, :, h * d:(h + 1) * d]
        k = k_all[:, :, h * d:(h + 1) * d]
        v = v_all[:, :, h * d:(h + 1) * d]
        s = jnp.einsum("wtd,wsd->wts", q, k,
                       preferred_element_type=jnp.float32) + addend
        m = jnp.max(s, axis=-1, keepdims=True)
        p = jnp.exp(s - m)
        denom = jnp.sum(p, axis=-1, keepdims=True)
        attn = p * pl.reciprocal(denom, approx=True)   # EUP slot, ~free vs divide
        head_outs.append(
            jnp.einsum("wts,wsd->wtd", attn, v, preferred_element_type=jnp.float32))
    out = jnp.concatenate(head_outs, axis=-1)          # (WB, T, E), lane-dense store
    o_ref[...] = out.astype(o_ref.dtype)


def _window_attn_nomask_kernel(qkv_ref, bias_ref, o_ref, *, num_heads, scale):
    wb = qkv_ref.shape[0]
    t = bias_ref.shape[0]
    # hoist the broadcast out of the per-head loop (JAX does not CSE broadcast_in_dim)
    addend = jnp.broadcast_to(bias_ref[...].astype(jnp.float32)[None, :, :], (wb, t, t))
    _attn_core(qkv_ref[...], addend, o_ref, num_heads, scale)


def _window_attn_mask_kernel(qkv_ref, biasmask_ref, o_ref, *, num_heads, scale):
    _attn_core(qkv_ref[...], biasmask_ref[...].astype(jnp.float32),
               o_ref, num_heads, scale)


# --------------------------- Pallas wrappers ---------------------------

def _row_tile(n, target):
    """Largest multiple-of-8 divisor of n that is <= target; else full n."""
    t = min(target, n)
    t -= t % 8
    while t >= 8:
        if n % t == 0:
            return t
        t -= 8
    return n


_PARALLEL1 = pltpu.CompilerParams(dimension_semantics=("parallel",))


def pallas_ln_linear(x2d, gamma, beta, w, b, *, block_rows=256):
    n, e = x2d.shape
    f = w.shape[1]
    tm = _row_tile(n, block_rows)
    return pl.pallas_call(
        _ln_linear_kernel,
        out_shape=jax.ShapeDtypeStruct((n, f), x2d.dtype),
        grid=(n // tm,),
        in_specs=[pl.BlockSpec((tm, e), lambda i: (i, 0)),
                  pl.BlockSpec((1, e), lambda i: (0, 0)),
                  pl.BlockSpec((1, e), lambda i: (0, 0)),
                  pl.BlockSpec((e, f), lambda i: (0, 0)),
                  pl.BlockSpec((1, f), lambda i: (0, 0))],
        out_specs=pl.BlockSpec((tm, f), lambda i: (i, 0)),
        compiler_params=_PARALLEL1,
    )(x2d, gamma.reshape(1, e), beta.reshape(1, e), w, b.reshape(1, f))


def pallas_proj_res_ln_mlp_res(a2d, wp, bp, res, gamma, beta, w1, b1, w2, b2,
                               *, block_rows=256):
    n, e = a2d.shape
    hdim = w1.shape[1]
    tm = _row_tile(n, block_rows)
    return pl.pallas_call(
        _proj_res_ln_mlp_res_kernel,
        out_shape=jax.ShapeDtypeStruct((n, e), a2d.dtype),
        grid=(n // tm,),
        in_specs=[pl.BlockSpec((tm, e), lambda i: (i, 0)),
                  pl.BlockSpec((e, e), lambda i: (0, 0)),
                  pl.BlockSpec((1, e), lambda i: (0, 0)),
                  pl.BlockSpec((tm, e), lambda i: (i, 0)),
                  pl.BlockSpec((1, e), lambda i: (0, 0)),
                  pl.BlockSpec((1, e), lambda i: (0, 0)),
                  pl.BlockSpec((e, hdim), lambda i: (0, 0)),
                  pl.BlockSpec((1, hdim), lambda i: (0, 0)),
                  pl.BlockSpec((hdim, e), lambda i: (0, 0)),
                  pl.BlockSpec((1, e), lambda i: (0, 0))],
        out_specs=pl.BlockSpec((tm, e), lambda i: (i, 0)),
        compiler_params=_PARALLEL1,
    )(a2d, wp, bp.reshape(1, e), res, gamma.reshape(1, e), beta.reshape(1, e),
      w1, b1.reshape(1, hdim), w2, b2.reshape(1, e))


def pallas_window_attention(qkv_win, rel_bias, mask, num_heads, scale, windows_per_block):
    """qkv_win: (NWtot, T, 3E) packed QKV per window (batch-major window ordering).

    mask: None (non-shifted block) or (NW, T, T) per-image shifted-window mask, where
    NW == windows_per_block so the same (bias+mask) block is reused at every grid step.
    """
    nwt, t, three_e = qkv_win.shape
    e = three_e // 3
    wb = windows_per_block
    assert nwt % wb == 0
    grid = (nwt // wb,)
    qkv_spec = pl.BlockSpec((wb, t, three_e), lambda i: (i, 0, 0))
    out_spec = pl.BlockSpec((wb, t, e), lambda i: (i, 0, 0))
    out_shape = jax.ShapeDtypeStruct((nwt, t, e), qkv_win.dtype)

    if mask is None:
        kern = functools.partial(_window_attn_nomask_kernel,
                                 num_heads=num_heads, scale=scale)
        return pl.pallas_call(
            kern, out_shape=out_shape, grid=grid,
            in_specs=[qkv_spec, pl.BlockSpec((t, t), lambda i: (0, 0))],
            out_specs=out_spec,
            compiler_params=_PARALLEL1,
        )(qkv_win, rel_bias)

    assert mask.shape[0] == wb
    # Fold the relative-position bias into the shift mask once (tiny XLA add); the
    # kernel then has a single additive term and one fewer input DMA.
    bias_mask = (rel_bias[None, :, :] + mask).astype(qkv_win.dtype)
    kern = functools.partial(_window_attn_mask_kernel,
                             num_heads=num_heads, scale=scale)
    biasmask_spec = pl.BlockSpec((wb, t, t), lambda i: (0, 0, 0))  # resident, reused
    return pl.pallas_call(
        kern, out_shape=out_shape, grid=grid,
        in_specs=[qkv_spec, biasmask_spec], out_specs=out_spec,
        compiler_params=_PARALLEL1,
    )(qkv_win, bias_mask)


# --------------------------- pure-JAX reference ops ---------------------------

_HI = jax.lax.Precision.HIGHEST


def _ref_layernorm(x2d, gamma, beta):
    x = x2d.astype(jnp.float32)
    mu = jnp.mean(x, -1, keepdims=True)
    var = jnp.mean((x - mu) ** 2, -1, keepdims=True)
    return (x - mu) * jax.lax.rsqrt(var + EPS) * gamma.reshape(1, -1) + beta.reshape(1, -1)


def ref_ln_linear(x2d, gamma, beta, w, b, **_):
    return jnp.dot(_ref_layernorm(x2d, gamma, beta), w, precision=_HI) + b.reshape(1, -1)


def ref_proj_res_ln_mlp_res(a2d, wp, bp, res, gamma, beta, w1, b1, w2, b2, **_):
    x1 = res + jnp.dot(a2d, wp, precision=_HI) + bp.reshape(1, -1)
    y = _ref_layernorm(x1, gamma, beta)
    h = jnp.dot(y, w1, precision=_HI) + b1.reshape(1, -1)
    h = 0.5 * h * (1.0 + jax.lax.erf(h * _INV_SQRT2))
    return x1 + jnp.dot(h, w2, precision=_HI) + b2.reshape(1, -1)


def ref_window_attention(qkv_win, rel_bias, mask, num_heads, scale, windows_per_block):
    nwt, t, three_e = qkv_win.shape
    e = three_e // 3
    d = e // num_heads
    q, k, v = jnp.split(qkv_win.astype(jnp.float32), 3, axis=-1)
    q = q.reshape(nwt, t, num_heads, d)
    k = k.reshape(nwt, t, num_heads, d)
    v = v.reshape(nwt, t, num_heads, d)
    s = jnp.einsum("nthd,nshd->nhts", q, k, precision=_HI) * scale
    s = s + rel_bias[None, None]
    if mask is not None:
        s = s + jnp.tile(mask, (nwt // mask.shape[0], 1, 1))[:, None]
    a = jax.nn.softmax(s, axis=-1)
    o = jnp.einsum("nhts,nshd->nthd", a, v, precision=_HI)
    return o.reshape(nwt, t, e)


# --------------------------- SwinEncoder forward (shared orchestration) ---------------------------

def make_shift_mask(gh, gw, wh, ww):
    """Standard Swin shifted-window attention mask, shape (num_windows, T, T), 0 / -1e9."""
    sh, sw = wh // 2, ww // 2
    img = np.zeros((gh, gw), dtype=np.int32)
    cnt = 0
    for hs in (slice(0, gh - wh), slice(gh - wh, gh - sh), slice(gh - sh, gh)):
        for ws in (slice(0, gw - ww), slice(gw - ww, gw - sw), slice(gw - sw, gw)):
            img[hs, ws] = cnt
            cnt += 1
    win = img.reshape(gh // wh, wh, gw // ww, ww).transpose(0, 2, 1, 3).reshape(-1, wh * ww)
    diff = win[:, :, None] != win[:, None, :]
    return jnp.asarray(np.where(diff, -1e9, 0.0).astype(np.float32))


def swin_encoder_forward(x, params, cfg, ops):
    B, L, E = x.shape
    gh, gw = cfg["patch_grid"]
    wh, ww = cfg["window"]
    H = cfg["num_heads"]
    D = E // H
    T = wh * ww
    nwh, nww = gh // wh, gw // ww
    NW = nwh * nww
    scale = 1.0 / math.sqrt(D)
    shift_mask = cfg["shift_mask"]          # (NW, T, T), NOT tiled by batch

    def partition(a, c):  # (B, gh, gw, c) -> (B*NW, T, c)   single transpose for packed QKV
        a = a.reshape(B, nwh, wh, nww, ww, c)
        return a.transpose(0, 1, 3, 2, 4, 5).reshape(B * NW, T, c)

    def unpartition(o):   # (B*NW, T, E) -> (B, gh, gw, E)
        o = o.reshape(B, nwh, nww, wh, ww, E)
        return o.transpose(0, 1, 3, 2, 4, 5).reshape(B, gh, gw, E)

    def residual_pair(xin, p, shifted):
        """x = x + (S)WMSA(ln(x));  x = x + MLP(ln(x))   — 3 pallas_calls total."""
        # 1) fused LN + QKV projection
        qkv = ops["ln_linear"](xin.reshape(B * L, E), params["ln_g"], params["ln_b"],
                               p["w_qkv"], p["b_qkv"])
        qkv = qkv.reshape(B, gh, gw, 3 * E)
        if shifted:
            qkv = jnp.roll(qkv, shift=(-(wh // 2), -(ww // 2)), axis=(1, 2))
        qkv_win = partition(qkv, 3 * E)                       # (B*NW, T, 3E)
        mask = shift_mask if shifted else None                # no zero-mask DMA for WMSA
        # 2) windowed MSA
        o = ops["attn"](qkv_win, p["rel_bias"], mask, H, scale, NW)
        o = unpartition(o)
        if shifted:
            o = jnp.roll(o, shift=(wh // 2, ww // 2), axis=(1, 2))
        # 3) fused [proj + residual] -> LN -> MLP -> residual
        out = ops["proj_mlp"](o.reshape(B * L, E), p["w_proj"], p["b_proj"],
                              xin.reshape(B * L, E),
                              params["ln_g"], params["ln_b"],
                              params["mlp_w1"], params["mlp_b1"],
                              params["mlp_w2"], params["mlp_b2"])
        return out.reshape(B, L, E)

    # x = x + WMSA(ln(x)); x = x + MLP(ln(x)); x = x + SWMSA(ln(x)); x = x + MLP(ln(x))
    x = residual_pair(x, params["wmsa"], False)
    x = residual_pair(x, params["swmsa"], True)
    return x


# --------------------------- parameter init ---------------------------

def init_params(key, emb, t_tokens):
    s = 0.05

    def w(k, shape):
        return (s * jax.random.normal(k, shape)).astype(jnp.float32)

    keys = jax.random.split(key, 6)

    def msa_params(k0, k1, k2, k3, k4):
        return {
            "w_qkv": w(k0, (emb, 3 * emb)),
            "b_qkv": w(k1, (3 * emb,)),
            "w_proj": w(k2, (emb, emb)),
            "b_proj": w(k3, (emb,)),
            "rel_bias": w(k4, (t_tokens, t_tokens)),
        }

    return {
        "ln_g": jnp.ones((emb,), jnp.float32),
        "ln_b": jnp.zeros((emb,), jnp.float32),
        "wmsa": msa_params(*jax.random.split(keys[0], 5)),
        "swmsa": msa_params(*jax.random.split(keys[1], 5)),
        "mlp_w1": w(keys[2], (emb, 4 * emb)),
        "mlp_b1": w(keys[3], (4 * emb,)),
        "mlp_w2": w(keys[4], (4 * emb, emb)),
        "mlp_b2": w(keys[5], (emb,)),
    }


# --------------------------- main ---------------------------

if __name__ == "__main__":
    B = 2
    emb = 64            # emb_size (divisible by num_heads)
    heads = 4           # num_heads
    patch_grid = (16, 16)
    window = (8, 4)     # divides patch_grid evenly
    L = patch_grid[0] * patch_grid[1]
    T = window[0] * window[1]

    key = jax.random.PRNGKey(0)
    kx, kp = jax.random.split(key)
    x = jax.random.normal(kx, (B, L, emb), dtype=jnp.float32)
    params = init_params(kp, emb, T)

    cfg = {
        "patch_grid": patch_grid,
        "window": window,
        "num_heads": heads,
        "shift_mask": make_shift_mask(patch_grid[0], patch_grid[1], window[0], window[1]),
    }

    pallas_ops = {"ln_linear": pallas_ln_linear,
                  "proj_mlp": pallas_proj_res_ln_mlp_res,
                  "attn": pallas_window_attention}
    ref_ops = {"ln_linear": ref_ln_linear,
               "proj_mlp": ref_proj_res_ln_mlp_res,
               "attn": ref_window_attention}

    out = swin_encoder_forward(x, params, cfg, pallas_ops)
    out = jax.block_until_ready(out)

    ref = swin_encoder_forward(x, params, cfg, ref_ops)
    assert out.shape == (B, L, emb) and out.dtype == jnp.float32
    np.testing.assert_allclose(np.asarray(out), np.asarray(ref), atol=5e-3, rtol=5e-3)

    print("KERNEL_OK")
</pallas_src>

<mosaic_0001>
module attributes {stable_mosaic.version = 11 : i64} {
  func.func @_ln_linear_kernel(%arg0: i32, %arg1: memref<256x64xf32, #tpu.memory_space<vmem>>, %arg2: memref<1x64xf32, #tpu.memory_space<vmem>>, %arg3: memref<1x64xf32, #tpu.memory_space<vmem>>, %arg4: memref<64x192xf32, #tpu.memory_space<vmem>>, %arg5: memref<1x192xf32, #tpu.memory_space<vmem>>, %arg6: memref<256x192xf32, #tpu.memory_space<vmem>>) attributes {dimension_semantics = [#tpu.dimension_semantics<parallel>], iteration_bounds = array<i64: 2>, scalar_prefetch = 0 : i64, scratch_operands = 0 : i64, tpu.core_type = #tpu.core_type<tc>, window_params = [{transform_indices = @transform_0, window_bounds = array<i64: 256, 64>}, {pipeline_mode = #tpu.pipeline_mode<synchronous>, transform_indices = @transform_1, window_bounds = array<i64: 1, 64>}, {pipeline_mode = #tpu.pipeline_mode<synchronous>, transform_indices = @transform_2, window_bounds = array<i64: 1, 64>}, {pipeline_mode = #tpu.pipeline_mode<synchronous>, transform_indices = @transform_3, window_bounds = array<i64: 64, 192>}, {pipeline_mode = #tpu.pipeline_mode<synchronous>, transform_indices = @transform_4, window_bounds = array<i64: 1, 192>}, {transform_indices = @transform_5, window_bounds = array<i64: 256, 192>}]} {
    %c0 = arith.constant 0 : index
    %c0_0 = arith.constant 0 : index
    %0 = vector.load %arg1[%c0, %c0_0] : memref<256x64xf32, #tpu.memory_space<vmem>>, vector<256x64xf32>
    %c0_1 = arith.constant 0 : index
    %c0_2 = arith.constant 0 : index
    %1 = vector.load %arg2[%c0_1, %c0_2] : memref<1x64xf32, #tpu.memory_space<vmem>>, vector<1x64xf32>
    %c0_3 = arith.constant 0 : index
    %c0_4 = arith.constant 0 : index
    %2 = vector.load %arg3[%c0_3, %c0_4] : memref<1x64xf32, #tpu.memory_space<vmem>>, vector<1x64xf32>
    %cst = arith.constant dense<0.000000e+00> : vector<256xf32>
    %3 = vector.multi_reduction <add>, %0, %cst [1] : vector<256x64xf32> to vector<256xf32>
    %4 = vector.shape_cast %3 : vector<256xf32> to vector<256x1xf32>
    %cst_5 = arith.constant 6.400000e+01 : f32
    %5 = vector.broadcast %cst_5 : f32 to vector<256x1xf32>
    %6 = arith.divf %4, %5 : vector<256x1xf32>
    %7 = vector.broadcast %6 : vector<256x1xf32> to vector<256x64xf32>
    %8 = arith.subf %0, %7 : vector<256x64xf32>
    %9 = arith.mulf %8, %8 : vector<256x64xf32>
    %cst_6 = arith.constant dense<0.000000e+00> : vector<256xf32>
    %10 = vector.multi_reduction <add>, %9, %cst_6 [1] : vector<256x64xf32> to vector<256xf32>
    %11 = vector.shape_cast %10 : vector<256xf32> to vector<256x1xf32>
    %cst_7 = arith.constant 6.400000e+01 : f32
    %12 = vector.broadcast %cst_7 : f32 to vector<256x1xf32>
    %13 = arith.divf %11, %12 : vector<256x1xf32>
    %14 = vector.broadcast %6 : vector<256x1xf32> to vector<256x64xf32>
    %15 = arith.subf %0, %14 : vector<256x64xf32>
    %cst_8 = arith.constant 9.99999974E-6 : f32
    %16 = vector.broadcast %cst_8 : f32 to vector<256x1xf32>
    %17 = arith.addf %13, %16 : vector<256x1xf32>
    %18 = math.rsqrt %17 : vector<256x1xf32>
    %19 = vector.broadcast %18 : vector<256x1xf32> to vector<256x64xf32>
    %20 = arith.mulf %15, %19 : vector<256x64xf32>
    %21 = vector.broadcast %1 : vector<1x64xf32> to vector<256x64xf32>
    %22 = arith.mulf %20, %21 : vector<256x64xf32>
    %23 = vector.broadcast %2 : vector<1x64xf32> to vector<256x64xf32>
    %24 = arith.addf %22, %23 : vector<256x64xf32>
    %c0_9 = arith.constant 0 : index
    %c0_10 = arith.constant 0 : index
    %25 = vector.load %arg4[%c0_9, %c0_10] : memref<64x192xf32, #tpu.memory_space<vmem>>, vector<64x192xf32>
    %cst_11 = arith.constant dense<0.000000e+00> : vector<256x192xf32>
    %26 = tpu.matmul %24, %25, %cst_11 {dimension_numbers = #tpu.dot_dimension_numbers<[1], [0], [0], [1], [0, 0, 1, 1], [], []>} : vector<256x64xf32>, vector<64x192xf32>, vector<256x192xf32> -> vector<256x192xf32>
    %c0_12 = arith.constant 0 : index
    %c0_13 = arith.constant 0 : index
    %27 = vector.load %arg5[%c0_12, %c0_13] : memref<1x192xf32, #tpu.memory_space<vmem>>, vector<1x192xf32>
    %28 = vector.broadcast %27 : vector<1x192xf32> to vector<256x192xf32>
    %29 = arith.addf %26, %28 : vector<256x192xf32>
    %c0_14 = arith.constant 0 : index
    %c0_15 = arith.constant 0 : index
    %30 = vector.load %arg6[%c0_14, %c0_15] : memref<256x192xf32, #tpu.memory_space<vmem>>, vector<256x192xf32>
    tpu.vector_store %arg6[%c0_14, %c0_15], %29 {strides = array<i32>} : memref<256x192xf32, #tpu.memory_space<vmem>>, vector<256x192xf32>,
    return
  }
  func.func @transform_0(%arg0: i32) -> (i32, i32) {
    %c0_i32 = arith.constant 0 : i32
    %c0_i32_0 = arith.constant 0 : i32
    return %arg0, %c0_i32 : i32, i32
  }
  func.func @transform_1(%arg0: i32) -> (i32, i32) {
    %c0_i32 = arith.constant 0 : i32
    %c0_i32_0 = arith.constant 0 : i32
    %c0_i32_1 = arith.constant 0 : i32
    return %c0_i32, %c0_i32_0 : i32, i32
  }
  func.func @transform_2(%arg0: i32) -> (i32, i32) {
    %c0_i32 = arith.constant 0 : i32
    %c0_i32_0 = arith.constant 0 : i32
    %c0_i32_1 = arith.constant 0 : i32
    return %c0_i32, %c0_i32_0 : i32, i32
  }
  func.func @transform_3(%arg0: i32) -> (i32, i32) {
    %c0_i32 = arith.constant 0 : i32
    %c0_i32_0 = arith.constant 0 : i32
    %c0_i32_1 = arith.constant 0 : i32
    return %c0_i32, %c0_i32_0 : i32, i32
  }
  func.func @transform_4(%arg0: i32) -> (i32, i32) {
    %c0_i32 = arith.constant 0 : i32
    %c0_i32_0 = arith.constant 0 : i32
    %c0_i32_1 = arith.constant 0 : i32
    return %c0_i32, %c0_i32_0 : i32, i32
  }
  func.func @transform_5(%arg0: i32) -> (i32, i32) {
    %c0_i32 = arith.constant 0 : i32
    %c0_i32_0 = arith.constant 0 : i32
    return %arg0, %c0_i32 : i32, i32
  }
}

</mosaic_0001>

<bundles_post_ra>
// kernel: tpu_custom_call.1
= control target key start
LH: loop header
LB: loop body
LE: loop exit
PB: predicated region body
PF: predicated region fallthrough
CT: control target
= control target key end

     0   :  { %s1444_s18 = smov 0   ;;  %s2206_s0 = inlined_call_operand.vmem [shape: f32[512,64], index: 0, kind: input, shape index: {}]   ;;  %s2207_s1 = inlined_call_operand.vmem [shape: f32[1,64], index: 1, kind: input, shape index: {}]   ;;  %s2208_s2 = inlined_call_operand.vmem [shape: f32[1,64], index: 2, kind: input, shape index: {}]   ;;  %s2209_s3 = inlined_call_operand.vmem [shape: f32[64,192], index: 3, kind: input, shape index: {}]   ;;  %s2210_s4 = inlined_call_operand.vmem [shape: f32[1,192], index: 4, kind: input, shape index: {}]   ;;  %s2211_s5 = inlined_call_operand.vmem [shape: f32[512,192], index: 5, kind: output, shape index: {}]  }
   0x1 LB: > { %s1261_s19 = sadd.s32 4294967295, %s1411_s18   ;;  %p1265_p0 = scmp.ge.s32.totalorder %s1411_s18, 1  ;;  %s1411_s18 = sphi %s1444_s18, %s15_s18  }
   0x2   : > { %p188_p1 = scmp.lt.s32.totalorder %s1411_s18, 3 }
   0x4   : > { %p189_p2 = pnand %p1265_p0, %p188_p1 }
   0x5   : > { %s1266_s20 = sshll.u32 (!%p189_p2), %s1261_s19, 5  ;;  %vm264_vm0 = vcmask (!%p189_p2), 523264  }
   0x6   : > { %192 = sbr.rel (%p189_p2) target bundleno = 610 (0x262), region = 40  ;;  %p218_p3 = scmp.lt.s32.totalorder (!%p189_p2), %s1266_s20, 63 }
   0xd   : > { %s2213_s20 = smov (!%p218_p3, %s1266_s20), 63 }
   0xe   : > { %s1267_s21 = sshll.u32 %s2213_s20, 3  ;;  %s1307_s15 = sshll.u32 %s2213_s20, 4 }
   0xf   : > { %s1458_s24 = scalar_lea.vmem %s2206_s0, %s1267_s21  ;;  %s2041_s19 = scalar_lea.vmem %s2211_s5, %s1307_s15 }
  0x10   : > { %v1461_v0 = vld [vmem:[%s1458_s24] sm:$0xff]  ;;  %v1464_v1 = vld [vmem:[%s1458_s24 + $0x8] sm:$0xff]  ;;  %v1481_v8 = vld [vmem:[%s1458_s24 + $0x10] sm:$0xff] }
  0x11   : > { %v1467_v2 = vld [vmem:[%s1458_s24 + $0x80] sm:$0xff]  ;;  %v265_v3 = vsel %vm264_vm0, %v1461_v0, 0.0  ;;  %v268_v4 = vsel %vm264_vm0, %v1464_v1, 0.0  ;;  %v1474_v5 = vld [vmem:[%s1458_s24 + $0x88] sm:$0xff]  ;;  %v1484_v9 = vld [vmem:[%s1458_s24 + $0x90] sm:$0xff]  ;;  %v271_v10 = vsel %vm264_vm0, %v1481_v8, 0.0 }
  0x12   : > { %266 = vadd.xlane.f32.xlu0 %v265_v3  ;;  %269 = vadd.xlane.f32.xlu1 %v268_v4  ;;  %v313_v6 = vsel %vm264_vm0, %v1467_v2, 0.0  ;;  %v316_v7 = vsel %vm264_vm0, %v1474_v5, 0.0  ;;  %v319_v11 = vsel %vm264_vm0, %v1484_v9, 0.0  ;;  %v1491_v12 = vld [vmem:[%s1458_s24 + $0x18] sm:$0xff]  ;;  %v1501_v16 = vld [vmem:[%s1458_s24 + $0x20] sm:$0xff]  ;;  %v1511_v20 = vld [vmem:[%s1458_s24 + $0x28] sm:$0xff] }
  0x13   : > { %v1494_v13 = vld [vmem:[%s1458_s24 + $0x98] sm:$0xff]  ;;  %v274_v14 = vsel %vm264_vm0, %v1491_v12, 0.0  ;;  %v1504_v17 = vld [vmem:[%s1458_s24 + $0xa0] sm:$0xff]  ;;  %v277_v18 = vsel %vm264_vm0, %v1501_v16, 0.0  ;;  %v1514_v21 = vld [vmem:[%s1458_s24 + $0xa8] sm:$0xff]  ;;  %v280_v22 = vsel %vm264_vm0, %v1511_v20, 0.0 }
  0x14   : > { %v322_v15 = vsel %vm264_vm0, %v1494_v13, 0.0  ;;  %v325_v19 = vsel %vm264_vm0, %v1504_v17, 0.0  ;;  %v328_v23 = vsel %vm264_vm0, %v1514_v21, 0.0  ;;  %v1521_v24 = vld [vmem:[%s1458_s24 + $0x30] sm:$0xff]  ;;  %v1531_v28 = vld [vmem:[%s1458_s24 + $0x38] sm:$0xff]  ;;  %v1541_v32 = vld [vmem:[%s1458_s24 + $0x40] sm:$0xff] }
  0x15   : > { %v1524_v25 = vld [vmem:[%s1458_s24 + $0xb0] sm:$0xff]  ;;  %v283_v26 = vsel %vm264_vm0, %v1521_v24, 0.0  ;;  %v1534_v29 = vld [vmem:[%s1458_s24 + $0xb8] sm:$0xff]  ;;  %v286_v30 = vsel %vm264_vm0, %v1531_v28, 0.0  ;;  %v1544_v33 = vld [vmem:[%s1458_s24 + $0xc0] sm:$0xff]  ;;  %v289_v34 = vsel %vm264_vm0, %v1541_v32, 0.0 }
  0x16   : > { %314 = vadd.xlane.f32.xlu0 %v313_v6  ;;  %317 = vadd.xlane.f32.xlu1 %v316_v7  ;;  %v331_v27 = vsel %vm264_vm0, %v1524_v25, 0.0  ;;  %v334_v31 = vsel %vm264_vm0, %v1534_v29, 0.0  ;;  %v337_v35 = vsel %vm264_vm0, %v1544_v33, 0.0  ;;  %v1551_v36 = vld [vmem:[%s1458_s24 + $0x48] sm:$0xff]  ;;  %v1561_v40 = vld [vmem:[%s1458_s24 + $0x50] sm:$0xff]  ;;  %v1571_v44 = vld [vmem:[%s1458_s24 + $0x58] sm:$0xff] }
  0x17   : > { %v1554_v37 = vld [vmem:[%s1458_s24 + $0xc8] sm:$0xff]  ;;  %v292_v38 = vsel %vm264_vm0, %v1551_v36, 0.0  ;;  %v1564_v41 = vld [vmem:[%s1458_s24 + $0xd0] sm:$0xff]  ;;  %v295_v42 = vsel %vm264_vm0, %v1561_v40, 0.0  ;;  %v1574_v45 = vld [vmem:[%s1458_s24 + $0xd8] sm:$0xff]  ;;  %v298_v46 = vsel %vm264_vm0, %v1571_v44, 0.0 }
  0x18   : > { %v340_v39 = vsel %vm264_vm0, %v1554_v37, 0.0  ;;  %v343_v43 = vsel %vm264_vm0, %v1564_v41, 0.0  ;;  %v346_v47 = vsel %vm264_vm0, %v1574_v45, 0.0  ;;  %v1581_v48 = vld [vmem:[%s1458_s24 + $0x60] sm:$0xff]  ;;  %v1591_v52 = vld [vmem:[%s1458_s24 + $0x68] sm:$0xff]  ;;  %v1601_v56 = vld [vmem:[%s1458_s24 + $0x70] sm:$0xff] }
  0x19   : > { %v1584_v49 = vld [vmem:[%s1458_s24 + $0xe0] sm:$0xff]  ;;  %v301_v50 = vsel %vm264_vm0, %v1581_v48, 0.0  ;;  %v1594_v53 = vld [vmem:[%s1458_s24 + $0xe8] sm:$0xff]  ;;  %v304_v54 = vsel %vm264_vm0, %v1591_v52, 0.0  ;;  %v1604_v57 = vld [vmem:[%s1458_s24 + $0xf0] sm:$0xff]  ;;  %v307_v58 = vsel %vm264_vm0, %v1601_v56, 0.0 }
  0x1a   : > { %272 = vadd.xlane.f32.xlu0 %v271_v10  ;;  %320 = vadd.xlane.f32.xlu1 %v319_v11  ;;  %v349_v51 = vsel %vm264_vm0, %v1584_v49, 0.0  ;;  %v352_v55 = vsel %vm264_vm0, %v1594_v53, 0.0  ;;  %v355_v59 = vsel %vm264_vm0, %v1604_v57, 0.0  ;;  %v1611_v60 = vld [vmem:[%s1458_s24 + $0x78] sm:$0xff] }
  0x1b   : > { %v1614_v61 = vld [vmem:[%s1458_s24 + $0xf8] sm:$0xff]  ;;  %v310_v62 = vsel %vm264_vm0, %v1611_v60, 0.0 }
  0x1c   : > { %v358_v63 = vsel %vm264_vm0, %v1614_v61, 0.0 }
  0x1e   : > { %275 = vadd.xlane.f32.xlu0 %v274_v14  ;;  %323 = vadd.xlane.f32.xlu1 %v322_v15 }
  0x22   : > { %278 = vadd.xlane.f32.xlu0 %v277_v18  ;;  %326 = vadd.xlane.f32.xlu1 %v325_v19 }
  0x26   : > { %281 = vadd.xlane.f32.xlu0 %v280_v22  ;;  %329 = vadd.xlane.f32.xlu1 %v328_v23 }
  0x2a   : > { %284 = vadd.xlane.f32.xlu0 %v283_v26  ;;  %332 = vadd.xlane.f32.xlu1 %v331_v27 }
  0x2e   : > { %287 = vadd.xlane.f32.xlu0 %v286_v30  ;;  %335 = vadd.xlane.f32.xlu1 %v334_v31 }
  0x32   : > { %290 = vadd.xlane.f32.xlu0 %v289_v34  ;;  %338 = vadd.xlane.f32.xlu1 %v337_v35 }
  0x36   : > { %293 = vadd.xlane.f32.xlu0 %v292_v38  ;;  %341 = vadd.xlane.f32.xlu1 %v340_v39 }
  0x3a   : > { %296 = vadd.xlane.f32.xlu0 %v295_v42  ;;  %344 = vadd.xlane.f32.xlu1 %v343_v43 }
  0x3e   : > { %299 = vadd.xlane.f32.xlu0 %v298_v46  ;;  %347 = vadd.xlane.f32.xlu1 %v346_v47 }
  0x42   : > { %302 = vadd.xlane.f32.xlu0 %v301_v50  ;;  %350 = vadd.xlane.f32.xlu1 %v349_v51 }
  0x46   : > { %305 = vadd.xlane.f32.xlu0 %v304_v54  ;;  %353 = vadd.xlane.f32.xlu1 %v352_v55 }
  0x4a   : > { %308 = vadd.xlane.f32.xlu0 %v307_v58  ;;  %356 = vadd.xlane.f32.xlu1 %v355_v59 }
  0x4e   : > { %311 = vadd.xlane.f32.xlu0 %v310_v62  ;;  %359 = vadd.xlane.f32.xlu1 %v358_v63 }
  0x9f   : > { %v267_v3 = vpop.xlane.xlu0 %266  ;;  %v270_v4 = vpop.xlane.xlu1 %269 }
  0xa0   : > { %v362_v6 = vmul.f32 0.015625, %v267_v3  ;;  %v363_v7 = vmul.f32 0.015625, %v270_v4 }
  0xa2   : > { %v1621_v10 = vsub.f32 %v1461_v0, %v362_v6  ;;  %v1624_v11 = vsub.f32 %v1464_v1, %v363_v7 }
  0xa3   : > { %v315_v14 = vpop.xlane.xlu0 %314  ;;  %v318_v15 = vpop.xlane.xlu1 %317 }
  0xa4   : > { %v378_v18 = vmul.f32 0.015625, %v315_v14  ;;  %v379_v19 = vmul.f32 0.015625, %v318_v15  ;;  %v426_v22 = vmul.f32 %v1621_v10, %v1621_v10  ;;  %v427_v23 = vmul.f32 %v1624_v11, %v1624_v11 }
  0xa6   : > { %v1631_v26 = vsub.f32 %v1467_v2, %v378_v18  ;;  %v1634_v27 = vsub.f32 %v1474_v5, %v379_v19  ;;  %v458_v0 = vsel %vm264_vm0, %v426_v22, 0.0  ;;  %v461_v31 = vsel %vm264_vm0, %v427_v23, 0.0 }
  0xa7   : > { %459 = vadd.xlane.f32.xlu0 %v458_v0  ;;  %v273_v1 = vpop.xlane.xlu0 %272  ;;  %v321_v30 = vpop.xlane.xlu1 %320 }
  0xa8   : > { %v364_v34 = vmul.f32 0.015625, %v273_v1  ;;  %v380_v35 = vmul.f32 0.015625, %v321_v30  ;;  %v442_v38 = vmul.f32 %v1631_v26, %v1631_v26  ;;  %v443_v39 = vmul.f32 %v1634_v27, %v1634_v27 }
  0xaa   : > { %v1643_v2 = vsub.f32 %v1481_v8, %v364_v34  ;;  %v1646_v5 = vsub.f32 %v1484_v9, %v380_v35  ;;  %v506_v42 = vsel %vm264_vm0, %v442_v38, 0.0  ;;  %v509_v47 = vsel %vm264_vm0, %v443_v39, 0.0 }
  0xab   : > { %462 = vadd.xlane.f32.xlu0 %v461_v31  ;;  %507 = vadd.xlane.f32.xlu1 %v506_v42  ;;  %v276_v43 = vpop.xlane.xlu0 %275  ;;  %v324_v46 = vpop.xlane.xlu1 %323 }
  0xac   : > { %v365_v50 = vmul.f32 0.015625, %v276_v43  ;;  %v381_v51 = vmul.f32 0.015625, %v324_v46  ;;  %v428_v54 = vmul.f32 %v1643_v2, %v1643_v2  ;;  %v444_v8 = vmul.f32 %v1646_v5, %v1646_v5  ;;  %v761_v43 = vld [vmem:[%s2209_s3 + $0x18] sm:$0xff] }
  0xae   : > { %v1655_v55 = vsub.f32 %v1491_v12, %v365_v50  ;;  %v1658_v9 = vsub.f32 %v1494_v13, %v381_v51  ;;  %v464_v58 = vsel %vm264_vm0, %v428_v54, 0.0  ;;  %v512_v63 = vsel %vm264_vm0, %v444_v8, 0.0  ;;  %v760_v50 = vld [vmem:[%s2209_s3 + $0x10] sm:$0xff] }
  0xaf   : > { %510 = vadd.xlane.f32.xlu1 %v509_v47  ;;  %465 = vadd.xlane.f32.xlu0 %v464_v58  ;;  %v279_v59 = vpop.xlane.xlu0 %278  ;;  %v327_v62 = vpop.xlane.xlu1 %326  ;;  %v758_v47 = vld [vmem:[%s2209_s3] sm:$0xff] }
  0xb0   : > { %v366_v3 = vmul.f32 0.015625, %v279_v59  ;;  %v382_v4 = vmul.f32 0.015625, %v327_v62  ;;  %v429_v6 = vmul.f32 %v1655_v55, %v1655_v55  ;;  %v445_v12 = vmul.f32 %v1658_v9, %v1658_v9 }
  0xb2   : > { %v1667_v7 = vsub.f32 %v1501_v16, %v366_v3  ;;  %v1670_v13 = vsub.f32 %v1504_v17, %v382_v4  ;;  %v467_v14 = vsel %vm264_vm0, %v429_v6, 0.0  ;;  %v515_v19 = vsel %vm264_vm0, %v445_v12, 0.0  ;;  %v765_v12 = vld [vmem:[%s2209_s3 + $0x38] sm:$0xff] }
  0xb3   : > { %513 = vadd.xlane.f32.xlu1 %v512_v63  ;;  %468 = vadd.xlane.f32.xlu0 %v467_v14  ;;  %v282_v15 = vpop.xlane.xlu0 %281  ;;  %v330_v18 = vpop.xlane.xlu1 %329  ;;  %v1310_v63 = vpack.c.bf16 %v760_v50, %v758_v47 }
  0xb4   : > { %v367_v22 = vmul.f32 0.015625, %v282_v15  ;;  %v383_v23 = vmul.f32 0.015625, %v330_v18  ;;  %v430_v0 = vmul.f32 %v1667_v7, %v1667_v7  ;;  %v446_v16 = vmul.f32 %v1670_v13, %v1670_v13  ;;  %v762_v15 = vld [vmem:[%s2209_s3 + $0x20] sm:$0xff]  ;;  %v764_v18 = vld [vmem:[%s2209_s3 + $0x30] sm:$0xff] }
  0xb6   : > { %v1679_v1 = vsub.f32 %v1511_v20, %v367_v22  ;;  %v1682_v17 = vsub.f32 %v1514_v21, %v383_v23  ;;  %v470_v30 = vsel %vm264_vm0, %v430_v0, 0.0  ;;  %v518_v35 = vsel %vm264_vm0, %v446_v16, 0.0  ;;  %v759_v21 = vld [vmem:[%s2209_s3 + $0x8] sm:$0xff] }
  0xb7   : > { %516 = vadd.xlane.f32.xlu1 %v515_v19  ;;  %471 = vadd.xlane.f32.xlu0 %v470_v30  ;;  %v285_v31 = vpop.xlane.xlu0 %284  ;;  %v333_v34 = vpop.xlane.xlu1 %332  ;;  %v1308_v46 = vpack.c.bf16 %v761_v43, %v759_v21  ;;  %v768_v21 = vld [vmem:[%s2209_s3 + $0x50] sm:$0xff] }
  0xb8   : > { %v368_v38 = vmul.f32 0.015625, %v285_v31  ;;  %v384_v39 = vmul.f32 0.015625, %v333_v34  ;;  %v431_v42 = vmul.f32 %v1679_v1, %v1679_v1  ;;  %v447_v20 = vmul.f32 %v1682_v17, %v1682_v17 }
  0xb9   : > { %1309 = vmatprep.subr.bf16.mxu0 %v1308_v46  ;;  %1324 = vmatprep.subr.bf16.mxu1 %v1308_v46  ;;  %v1314_v31 = vpack.c.bf16 %v764_v18, %v762_v15 }
  0xba   : > { %v1703_v51 = vsub.f32 %v1521_v24, %v368_v38  ;;  %v1706_v54 = vsub.f32 %v1524_v25, %v384_v39  ;;  %v473_v8 = vsel %vm264_vm0, %v431_v42, 0.0  ;;  %v521_v62 = vsel %vm264_vm0, %v447_v20, 0.0  ;;  %v763_v25 = vld [vmem:[%s2209_s3 + $0x28] sm:$0xff]  ;;  %1311 = vmatpush1.bf16.msra.mxu0 %v1310_v63  ;;  %1328 = vmatpush1.bf16.msra.mxu1 %v1310_v63  ;;  %v769_v39 = vld [vmem:[%s2209_s3 + $0x58] sm:$0xff]  ;;  %v766_v20 = vld [vmem:[%s2209_s3 + $0x40] sm:$0xff] }
  0xbb   : > { %519 = vadd.xlane.f32.xlu1 %v518_v35  ;;  %474 = vadd.xlane.f32.xlu0 %v473_v8  ;;  %v288_v58 = vpop.xlane.xlu0 %287  ;;  %v336_v59 = vpop.xlane.xlu1 %335  ;;  %v1312_v14 = vpack.c.bf16 %v765_v12, %v763_v25  ;;  %v772_v25 = vld [vmem:[%s2209_s3 + $0x70] sm:$0xff] }
  0xbc   : > { %v369_v3 = vmul.f32 0.015625, %v288_v58  ;;  %v385_v4 = vmul.f32 0.015625, %v336_v59  ;;  %v432_v6 = vmul.f32 %v1703_v51, %v1703_v51  ;;  %v448_v24 = vmul.f32 %v1706_v54, %v1706_v54 }
  0xbd   : > { %1313 = vmatprep.subr.bf16.mxu0 %v1312_v14  ;;  %1325 = vmatprep.subr.bf16.mxu1 %v1312_v14  ;;  %v1318_v59 = vpack.c.bf16 %v768_v21, %v766_v20 }
  0xbe   : > { %v1727_v19 = vsub.f32 %v1531_v28, %v369_v3  ;;  %v1730_v22 = vsub.f32 %v1534_v29, %v385_v4  ;;  %v476_v23 = vsel %vm264_vm0, %v432_v6, 0.0  ;;  %v524_v30 = vsel %vm264_vm0, %v448_v24, 0.0  ;;  %v767_v29 = vld [vmem:[%s2209_s3 + $0x48] sm:$0xff]  ;;  %1315 = vmatpush1.bf16.msra.mxu0 %v1314_v31  ;;  %1329 = vmatpush1.bf16.msra.mxu1 %v1314_v31  ;;  %v773_v4 = vld [vmem:[%s2209_s3 + $0x78] sm:$0xff]  ;;  %v770_v24 = vld [vmem:[%s2209_s3 + $0x60] sm:$0xff] }
  0xbf   : > { %522 = vadd.xlane.f32.xlu1 %v521_v62  ;;  %477 = vadd.xlane.f32.xlu0 %v476_v23  ;;  %v291_v0 = vpop.xlane.xlu0 %290  ;;  %v339_v16 = vpop.xlane.xlu1 %338  ;;  %v1316_v42 = vpack.c.bf16 %v769_v39, %v767_v29 }
  0xc0   : > { %v370_v34 = vmul.f32 0.015625, %v291_v0  ;;  %v386_v35 = vmul.f32 0.015625, %v339_v16  ;;  %v433_v38 = vmul.f32 %v1727_v19, %v1727_v19  ;;  %v449_v28 = vmul.f32 %v1730_v22, %v1730_v22 }
  0xc1   : > { %1317 = vmatprep.subr.bf16.mxu0 %v1316_v42  ;;  %1326 = vmatprep.subr.bf16.mxu1 %v1316_v42  ;;  %v1322_v16 = vpack.c.bf16 %v772_v25, %v770_v24 }
  0xc2   : > { %v1751_v43 = vsub.f32 %v1541_v32, %v370_v34  ;;  %v1754_v46 = vsub.f32 %v1544_v33, %v386_v35  ;;  %v479_v47 = vsel %vm264_vm0, %v433_v38, 0.0  ;;  %v527_v58 = vsel %vm264_vm0, %v449_v28, 0.0  ;;  %v771_v33 = vld [vmem:[%s2209_s3 + $0x68] sm:$0xff]  ;;  %1319 = vmatpush1.bf16.msra.mxu0 %v1318_v59  ;;  %1330 = vmatpush1.bf16.msra.mxu1 %v1318_v59 }
  0xc3   : > { %525 = vadd.xlane.f32.xlu1 %v524_v30  ;;  %480 = vadd.xlane.f32.xlu0 %v479_v47  ;;  %v294_v50 = vpop.xlane.xlu0 %293  ;;  %v342_v8 = vpop.xlane.xlu1 %341  ;;  %v1320_v6 = vpack.c.bf16 %v773_v4, %v771_v33  ;;  %v1413_v28 = vmov 0.0  }
  0xc4   : > { %v371_v62 = vmul.f32 0.015625, %v294_v50  ;;  %v387_v63 = vmul.f32 0.015625, %v342_v8  ;;  %v434_v3 = vmul.f32 %v1751_v43, %v1751_v43  ;;  %v450_v32 = vmul.f32 %v1754_v46, %v1754_v46  ;;  %946 = vmatprep.mubr.f32.mxu0 %v1413_v28  ;;  %1042 = vmatprep.mubr.f32.mxu1 %v1413_v28 }
  0xc5   : > { %1321 = vmatprep.subr.bf16.mxu0 %v1320_v6  ;;  %1327 = vmatprep.subr.bf16.mxu1 %v1320_v6 }
  0xc6   : > { %v1775_v12 = vsub.f32 %v1551_v36, %v371_v62  ;;  %v1778_v14 = vsub.f32 %v1554_v37, %v387_v63  ;;  %v482_v15 = vsel %vm264_vm0, %v434_v3, 0.0  ;;  %v530_v0 = vsel %vm264_vm0, %v450_v32, 0.0  ;;  %1323 = vmatpush1.bf16.msra.mxu0 %v1322_v16  ;;  %1331 = vmatpush1.bf16.msra.mxu1 %v1322_v16 }
  0xc7   : > { %528 = vadd.xlane.f32.xlu1 %v527_v58  ;;  %483 = vadd.xlane.f32.xlu0 %v482_v15  ;;  %v297_v18 = vpop.xlane.xlu0 %296  ;;  %v345_v23 = vpop.xlane.xlu1 %344 }
  0xc8   : > { %v372_v30 = vmul.f32 0.015625, %v297_v18  ;;  %v388_v31 = vmul.f32 0.015625, %v345_v23  ;;  %v435_v34 = vmul.f32 %v1775_v12, %v1775_v12  ;;  %v451_v36 = vmul.f32 %v1778_v14, %v1778_v14 }
  0xca   : > { %v1787_v37 = vsub.f32 %v1561_v40, %v372_v30  ;;  %v1790_v35 = vsub.f32 %v1564_v41, %v388_v31  ;;  %v485_v38 = vsel %vm264_vm0, %v435_v34, 0.0  ;;  %v533_v42 = vsel %vm264_vm0, %v451_v36, 0.0 }
  0xcb   : > { %531 = vadd.xlane.f32.xlu1 %v530_v0  ;;  %486 = vadd.xlane.f32.xlu0 %v485_v38  ;;  %v300_v29 = vpop.xlane.xlu0 %299  ;;  %v348_v39 = vpop.xlane.xlu1 %347 }
  0xcc   : > { %v373_v20 = vmul.f32 0.015625, %v300_v29  ;;  %v389_v21 = vmul.f32 0.015625, %v348_v39  ;;  %v436_v40 = vmul.f32 %v1787_v37, %v1787_v37  ;;  %v452_v41 = vmul.f32 %v1790_v35, %v1790_v35 }
  0xce   : > { %v1801_v47 = vsub.f32 %v1571_v44, %v373_v20  ;;  %v1804_v50 = vsub.f32 %v1574_v45, %v389_v21  ;;  %v488_v8 = vsel %vm264_vm0, %v436_v40, 0.0  ;;  %v536_v62 = vsel %vm264_vm0, %v452_v41, 0.0 }
  0xcf   : > { %534 = vadd.xlane.f32.xlu1 %v533_v42  ;;  %489 = vadd.xlane.f32.xlu0 %v488_v8  ;;  %v303_v58 = vpop.xlane.xlu0 %302  ;;  %v351_v59 = vpop.xlane.xlu1 %350 }
  0xd0   : > { %v374_v63 = vmul.f32 0.015625, %v303_v58  ;;  %v390_v3 = vmul.f32 0.015625, %v351_v59  ;;  %v437_v32 = vmul.f32 %v1801_v47, %v1801_v47  ;;  %v453_v44 = vmul.f32 %v1804_v50, %v1804_v50 }
  0xd2   : > { %v1813_v33 = vsub.f32 %v1581_v48, %v374_v63  ;;  %v1816_v45 = vsub.f32 %v1584_v49, %v390_v3  ;;  %v491_v4 = vsel %vm264_vm0, %v437_v32, 0.0  ;;  %v539_v25 = vsel %vm264_vm0, %v453_v44, 0.0 }
  0xd3   : > { %537 = vadd.xlane.f32.xlu1 %v536_v62  ;;  %492 = vadd.xlane.f32.xlu0 %v491_v4  ;;  %v306_v6 = vpop.xlane.xlu0 %305  ;;  %v354_v24 = vpop.xlane.xlu1 %353 }
  0xd4   : > { %v375_v15 = vmul.f32 0.015625, %v306_v6  ;;  %v391_v18 = vmul.f32 0.015625, %v354_v24  ;;  %v438_v23 = vmul.f32 %v1813_v33, %v1813_v33  ;;  %v454_v48 = vmul.f32 %v1816_v45, %v1816_v45 }
  0xd6   : > { %v1825_v0 = vsub.f32 %v1591_v52, %v375_v15  ;;  %v1828_v49 = vsub.f32 %v1594_v53, %v391_v18  ;;  %v494_v16 = vsel %vm264_vm0, %v438_v23, 0.0  ;;  %v542_v34 = vsel %vm264_vm0, %v454_v48, 0.0 }
  0xd7   : > { %540 = vadd.xlane.f32.xlu1 %v539_v25  ;;  %495 = vadd.xlane.f32.xlu0 %v494_v16  ;;  %v309_v30 = vpop.xlane.xlu0 %308  ;;  %v357_v31 = vpop.xlane.xlu1 %356 }
  0xd8   : > { %v376_v36 = vmul.f32 0.015625, %v309_v30  ;;  %v392_v38 = vmul.f32 0.015625, %v357_v31  ;;  %v439_v29 = vmul.f32 %v1825_v0, %v1825_v0  ;;  %v455_v52 = vmul.f32 %v1828_v49, %v1828_v49 }
  0xda   : > { %v1837_v39 = vsub.f32 %v1601_v56, %v376_v36  ;;  %v1840_v53 = vsub.f32 %v1604_v57, %v392_v38  ;;  %v497_v42 = vsel %vm264_vm0, %v439_v29, 0.0  ;;  %v545_v40 = vsel %vm264_vm0, %v455_v52, 0.0 }
  0xdb   : > { %543 = vadd.xlane.f32.xlu1 %v542_v34  ;;  %498 = vadd.xlane.f32.xlu0 %v497_v42  ;;  %v312_v20 = vpop.xlane.xlu0 %311  ;;  %v360_v21 = vpop.xlane.xlu1 %359 }
  0xdc   : > { %v377_v41 = vmul.f32 0.015625, %v312_v20  ;;  %v393_v8 = vmul.f32 0.015625, %v360_v21  ;;  %v440_v58 = vmul.f32 %v1837_v39, %v1837_v39  ;;  %v456_v56 = vmul.f32 %v1840_v53, %v1840_v53 }
  0xde   : > { %v1849_v59 = vsub.f32 %v1611_v60, %v377_v41  ;;  %v1852_v57 = vsub.f32 %v1614_v61, %v393_v8  ;;  %v500_v62 = vsel %vm264_vm0, %v440_v58, 0.0  ;;  %v548_v63 = vsel %vm264_vm0, %v456_v56, 0.0  ;;  %v1865_v8 = vld [vmem:[%s2207_s1] ss:$0 sm:$0xff] }
  0xdf   : > { %546 = vadd.xlane.f32.xlu1 %v545_v40  ;;  %501 = vadd.xlane.f32.xlu0 %v500_v62 }
  0xe0   : > { %v441_v3 = vmul.f32 %v1849_v59, %v1849_v59  ;;  %v457_v32 = vmul.f32 %v1852_v57, %v1852_v57 }
  0xe2   : > { %v503_v44 = vsel %vm264_vm0, %v441_v3, 0.0  ;;  %v551_v60 = vsel %vm264_vm0, %v457_v32, 0.0  ;;  %v1871_v32 = vld [vmem:[%s2208_s2] ss:$0 sm:$0xff] }
  0xe3   : > { %549 = vadd.xlane.f32.xlu1 %v548_v63  ;;  %504 = vadd.xlane.f32.xlu0 %v503_v44 }
  0xe7   : > { %552 = vadd.xlane.f32.xlu1 %v551_v60 }
 0x134   : > { %v460_v61 = vpop.xlane.xlu0 %459 }
 0x135   : > { %v554_v4 = vmul.f32 0.015625, %v460_v61 }
 0x137   : > { %v586_v6 = vadd.f32 1e-05, %v554_v4 }
 0x138   : > { %v508_v24 = vpop.xlane.xlu1 %507  ;;  %v463_v25 = vpop.xlane.xlu0 %462 }
 0x139   : > { %1341 = vrsqrt.f32 %v586_v6  ;;  %v570_v15 = vmul.f32 0.015625, %v508_v24  ;;  %v555_v18 = vmul.f32 0.015625, %v463_v25 }
 0x13b   : > { %v602_v23 = vadd.f32 1e-05, %v570_v15  ;;  %v587_v48 = vadd.f32 1e-05, %v555_v18 }
 0x13c   : > { %v511_v16 = vpop.xlane.xlu1 %510  ;;  %v466_v30 = vpop.xlane.xlu0 %465 }
 0x13d   : > { %1343 = vrsqrt.f32 %v602_v23  ;;  %v571_v31 = vmul.f32 0.015625, %v511_v16  ;;  %v556_v34 = vmul.f32 0.015625, %v466_v30 }
 0x13e   : > { %1345 = vrsqrt.f32 %v587_v48 }
 0x13f   : > { %v603_v36 = vadd.f32 1e-05, %v571_v31  ;;  %v588_v38 = vadd.f32 1e-05, %v556_v34 }
 0x140   : > { %v514_v29 = vpop.xlane.xlu1 %513  ;;  %v469_v52 = vpop.xlane.xlu0 %468 }
 0x141   : > { %1347 = vrsqrt.f32 %v603_v36  ;;  %v572_v42 = vmul.f32 0.015625, %v514_v29  ;;  %v557_v20 = vmul.f32 0.015625, %v469_v52 }
 0x142   : > { %1349 = vrsqrt.f32 %v588_v38 }
 0x143   : > { %v1342_v21 = vpop.eup %1341  ;;  %v604_v40 = vadd.f32 1e-05, %v572_v42  ;;  %v589_v41 = vadd.f32 1e-05, %v557_v20 }
 0x144   : > { %v517_v58 = vpop.xlane.xlu1 %516  ;;  %v472_v56 = vpop.xlane.xlu0 %471  ;;  %v650_v62 = vmul.f32 %v1342_v21, %v1621_v10 }
 0x145   : > { %1351 = vrsqrt.f32 %v604_v40  ;;  %v573_v63 = vmul.f32 0.015625, %v517_v58  ;;  %v558_v3 = vmul.f32 0.015625, %v472_v56 }
 0x146   : > { %1353 = vrsqrt.f32 %v589_v41  ;;  %v688_v44 = vmul.f32 %v1865_v8, %v650_v62 }
 0x147   : > { %v1344_v60 = vpop.eup %1343  ;;  %v605_v61 = vadd.f32 1e-05, %v573_v63  ;;  %v590_v4 = vadd.f32 1e-05, %v558_v3 }
 0x148   : > { %v1346_v6 = vpop.eup %1345  ;;  %v520_v24 = vpop.xlane.xlu1 %519  ;;  %v726_v15 = vadd.f32 %v1871_v32, %v688_v44  ;;  %v666_v10 = vmul.f32 %v1344_v60, %v1631_v26 }
 0x149   : > { %v475_v25 = vpop.xlane.xlu0 %474  ;;  %1355 = vrsqrt.f32 %v605_v61  ;;  %v574_v18 = vmul.f32 0.015625, %v520_v24  ;;  %v651_v48 = vmul.f32 %v1346_v6, %v1624_v11 }
 0x14a   : > { %v559_v23 = vmul.f32 0.015625, %v475_v25  ;;  %1357 = vrsqrt.f32 %v590_v4  ;;  %1273 = vmatmul.mubr.msk.f32.vlgmr.msra.gmra.mrb[0].mxu0 %vm264_vm0, %v726_v15  ;;  %v704_v16 = vmul.f32 %v1865_v8, %v666_v10 }
 0x14b   : > { %v1348_v30 = vpop.eup %1347  ;;  %v606_v31 = vadd.f32 1e-05, %v574_v18  ;;  %952 = vmatprep.mubr.f32.mxu0 %v1413_v28  ;;  %v689_v36 = vmul.f32 %v1865_v8, %v651_v48 }
 0x14c   : > { %v591_v34 = vadd.f32 1e-05, %v559_v23  ;;  %v1350_v38 = vpop.eup %1349  ;;  %v523_v29 = vpop.xlane.xlu1 %522  ;;  %v742_v52 = vadd.f32 %v1871_v32, %v704_v16  ;;  %v667_v42 = vmul.f32 %v1348_v30, %v1634_v27 }
 0x14d   : > { %v478_v26 = vpop.xlane.xlu0 %477  ;;  %1359 = vrsqrt.f32 %v606_v31  ;;  %v575_v11 = vmul.f32 0.015625, %v523_v29  ;;  %v727_v21 = vadd.f32 %v1871_v32, %v689_v36  ;;  %v652_v40 = vmul.f32 %v1350_v38, %v1643_v2 }
 0x14e   : > { %v560_v20 = vmul.f32 0.015625, %v478_v26  ;;  %1361 = vrsqrt.f32 %v591_v34  ;;  %1289 = vmatmul.mubr.msk.f32.vlgmr.msra.gmra.mrb[0].mxu1 %vm264_vm0, %v742_v52  ;;  %v705_v41 = vmul.f32 %v1865_v8, %v667_v42 }
 0x14f   : > { %v1352_v58 = vpop.eup %1351  ;;  %v607_v56 = vadd.f32 1e-05, %v575_v11  ;;  %1274 = vmatmul.mubr.msk.f32.gmra.mrb[2].mxu0 %vm264_vm0, %v727_v21  ;;  %1048 = vmatprep.mubr.f32.mxu1 %v1413_v28  ;;  %v690_v44 = vmul.f32 %v1865_v8, %v652_v40 }
 0x150   : > { %v592_v62 = vadd.f32 1e-05, %v560_v20  ;;  %v1354_v27 = vpop.eup %1353  ;;  %v526_v63 = vpop.xlane.xlu1 %525  ;;  %958 = vmatprep.mubr.f32.mxu0 %v1413_v28  ;;  %v743_v60 = vadd.f32 %v1871_v32, %v705_v41  ;;  %v668_v2 = vmul.f32 %v1352_v58, %v1646_v5 }
 0x151   : > { %v481_v3 = vpop.xlane.xlu0 %480  ;;  %1363 = vrsqrt.f32 %v607_v56  ;;  %v576_v61 = vmul.f32 0.015625, %v526_v63  ;;  %v653_v6 = vmul.f32 %v1354_v27, %v1655_v55  ;;  %v728_v24 = vadd.f32 %v1871_v32, %v690_v44 }
 0x152   : > { %v561_v4 = vmul.f32 0.015625, %v481_v3  ;;  %1365 = vrsqrt.f32 %v592_v62  ;;  %1290 = vmatmul.mubr.msk.f32.gmra.mrb[2].mxu1 %vm264_vm0, %v743_v60  ;;  %v706_v25 = vmul.f32 %v1865_v8, %v668_v2 }
 0x153   : > { %v1356_v15 = vpop.eup %1355  ;;  %v608_v10 = vadd.f32 1e-05, %v576_v61  ;;  %1054 = vmatprep.mubr.f32.mxu1 %v1413_v28  ;;  %v691_v23 = vmul.f32 %v1865_v8, %v653_v6  ;;  %1275 = vmatmul.mubr.msk.f32.gmra.mrb[4].mxu0 %vm264_vm0, %v728_v24 }
 0x154   : > { %v593_v18 = vadd.f32 1e-05, %v561_v4  ;;  %v1358_v5 = vpop.eup %1357  ;;  %v529_v48 = vpop.xlane.xlu1 %528  ;;  %v744_v55 = vadd.f32 %v1871_v32, %v706_v25  ;;  %v669_v30 = vmul.f32 %v1356_v15, %v1658_v9  ;;  %964 = vmatprep.mubr.f32.mxu0 %v1413_v28 }
 0x155   : > { %v484_v16 = vpop.xlane.xlu0 %483  ;;  %1367 = vrsqrt.f32 %v608_v10  ;;  %v577_v31 = vmul.f32 0.015625, %v529_v48  ;;  %v729_v36 = vadd.f32 %v1871_v32, %v691_v23  ;;  %v654_v38 = vmul.f32 %v1358_v5, %v1667_v7 }
 0x156   : > { %v562_v34 = vmul.f32 0.015625, %v484_v16  ;;  %1369 = vrsqrt.f32 %v593_v18  ;;  %1291 = vmatmul.mubr.msk.f32.gmra.mrb[4].mxu1 %vm264_vm0, %v744_v55  ;;  %v707_v29 = vmul.f32 %v1865_v8, %v669_v30 }
 0x157   : > { %v1360_v26 = vpop.eup %1359  ;;  %v609_v52 = vadd.f32 1e-05, %v577_v31  ;;  %1060 = vmatprep.mubr.f32.mxu1 %v1413_v28  ;;  %1276 = vmatmul.mubr.msk.f32.gmra.mrb[6].mxu0 %vm264_vm0, %v729_v36  ;;  %v692_v21 = vmul.f32 %v1865_v8, %v654_v38 }
 0x158   : > { %v594_v42 = vadd.f32 1e-05, %v562_v34  ;;  %v1362_v9 = vpop.eup %1361  ;;  %v532_v11 = vpop.xlane.xlu1 %531  ;;  %v745_v40 = vadd.f32 %v1871_v32, %v707_v29  ;;  %v670_v41 = vmul.f32 %v1360_v26, %v1670_v13  ;;  %970 = vmatprep.mubr.f32.mxu0 %v1413_v28 }
 0x159   : > { %v487_v20 = vpop.xlane.xlu0 %486  ;;  %1371 = vrsqrt.f32 %v609_v52  ;;  %v578_v7 = vmul.f32 0.015625, %v532_v11  ;;  %v655_v56 = vmul.f32 %v1362_v9, %v1679_v1  ;;  %v730_v62 = vadd.f32 %v1871_v32, %v692_v21 }
 0x15a   : > { %v563_v58 = vmul.f32 0.015625, %v487_v20  ;;  %1373 = vrsqrt.f32 %v594_v42  ;;  %1292 = vmatmul.mubr.msk.f32.gmra.mrb[6].mxu1 %vm264_vm0, %v745_v40  ;;  %v708_v27 = vmul.f32 %v1865_v8, %v670_v41 }
 0x15b   : > { %v1364_v63 = vpop.eup %1363  ;;  %v610_v3 = vadd.f32 1e-05, %v578_v7  ;;  %1066 = vmatprep.mubr.f32.mxu1 %v1413_v28  ;;  %v693_v13 = vmul.f32 %v1865_v8, %v655_v56  ;;  %1277 = vmatmul.mubr.msk.f32.gmra.mrb[8].mxu0 %vm264_vm0, %v730_v62 }
 0x15c   : > { %v595_v44 = vadd.f32 1e-05, %v563_v58  ;;  %v1366_v60 = vpop.eup %1365  ;;  %v535_v2 = vpop.xlane.xlu1 %534  ;;  %v746_v1 = vadd.f32 %v1871_v32, %v708_v27  ;;  %v671_v4 = vmul.f32 %v1364_v63, %v1682_v17  ;;  %976 = vmatprep.mubr.f32.mxu0 %v1413_v28 }
 0x15d   : > { %v490_v61 = vpop.xlane.xlu0 %489  ;;  %1375 = vrsqrt.f32 %v610_v3  ;;  %v579_v6 = vmul.f32 0.015625, %v535_v2  ;;  %v731_v25 = vadd.f32 %v1871_v32, %v693_v13  ;;  %v656_v15 = vmul.f32 %v1366_v60, %v1703_v51 }
 0x15e   : > { %v564_v24 = vmul.f32 0.015625, %v490_v61  ;;  %1377 = vrsqrt.f32 %v595_v44  ;;  %1293 = vmatmul.mubr.msk.f32.gmra.mrb[8].mxu1 %vm264_vm0, %v746_v1  ;;  %v709_v10 = vmul.f32 %v1865_v8, %v671_v4 }
 0x15f   : > { %v1368_v18 = vpop.eup %1367  ;;  %v611_v23 = vadd.f32 1e-05, %v579_v6  ;;  %1072 = vmatprep.mubr.f32.mxu1 %v1413_v28  ;;  %1278 = vmatmul.mubr.msk.f32.gmra.mrb[10].mxu0 %vm264_vm0, %v731_v25  ;;  %v694_v55 = vmul.f32 %v1865_v8, %v656_v15 }
 0x160   : > { %v596_v5 = vadd.f32 1e-05, %v564_v24  ;;  %v1370_v17 = vpop.eup %1369  ;;  %v538_v48 = vpop.xlane.xlu1 %537  ;;  %v747_v30 = vadd.f32 %v1871_v32, %v709_v10  ;;  %v672_v31 = vmul.f32 %v1368_v18, %v1706_v54  ;;  %982 = vmatprep.mubr.f32.mxu0 %v1413_v28 }
 0x161   : > { %v493_v16 = vpop.xlane.xlu0 %492  ;;  %1379 = vrsqrt.f32 %v611_v23  ;;  %v580_v51 = vmul.f32 0.015625, %v538_v48  ;;  %v657_v36 = vmul.f32 %v1370_v17, %v1727_v19  ;;  %v732_v38 = vadd.f32 %v1871_v32, %v694_v55 }
 0x162   : > { %v565_v34 = vmul.f32 0.015625, %v493_v16  ;;  %1381 = vrsqrt.f32 %v596_v5  ;;  %1294 = vmatmul.mubr.msk.f32.gmra.mrb[10].mxu1 %vm264_vm0, %v747_v30  ;;  %v710_v29 = vmul.f32 %v1865_v8, %v672_v31 }
 0x163   : > { %v1372_v26 = vpop.eup %1371  ;;  %v612_v52 = vadd.f32 1e-05, %v580_v51  ;;  %1078 = vmatprep.mubr.f32.mxu1 %v1413_v28  ;;  %v695_v54 = vmul.f32 %v1865_v8, %v657_v36  ;;  %1279 = vmatmul.mubr.msk.f32.gmra.mrb[12].mxu0 %vm264_vm0, %v732_v38 }
 0x164   : > { %v597_v42 = vadd.f32 1e-05, %v565_v34  ;;  %v1374_v9 = vpop.eup %1373  ;;  %v541_v11 = vpop.xlane.xlu1 %540  ;;  %v748_v19 = vadd.f32 %v1871_v32, %v710_v29  ;;  %v673_v21 = vmul.f32 %v1372_v26, %v1730_v22  ;;  %988 = vmatprep.mubr.f32.mxu0 %v1413_v28 }
 0x165   : > { %v496_v20 = vpop.xlane.xlu0 %495  ;;  %1383 = vrsqrt.f32 %v612_v52  ;;  %v581_v40 = vmul.f32 0.015625, %v541_v11  ;;  %v733_v7 = vadd.f32 %v1871_v32, %v695_v54  ;;  %v658_v58 = vmul.f32 %v1374_v9, %v1751_v43 }
 0x166   : > { %v566_v41 = vmul.f32 0.015625, %v496_v20  ;;  %1385 = vrsqrt.f32 %v597_v42  ;;  %1295 = vmatmul.mubr.msk.f32.gmra.mrb[12].mxu1 %vm264_vm0, %v748_v19  ;;  %v711_v56 = vmul.f32 %v1865_v8, %v673_v21 }
 0x167   : > { %v1376_v62 = vpop.eup %1375  ;;  %v613_v27 = vadd.f32 1e-05, %v581_v40  ;;  %1084 = vmatprep.mubr.f32.mxu1 %v1413_v28  ;;  %1280 = vmatmul.mubr.msk.f32.gmra.mrb[14].mxu0 %vm264_vm0, %v733_v7  ;;  %v696_v13 = vmul.f32 %v1865_v8, %v658_v58 }
 0x168   : > { %v598_v63 = vadd.f32 1e-05, %v566_v41  ;;  %v1378_v22 = vpop.eup %1377  ;;  %v544_v3 = vpop.xlane.xlu1 %543  ;;  %v749_v60 = vadd.f32 %v1871_v32, %v711_v56  ;;  %v674_v2 = vmul.f32 %v1376_v62, %v1754_v46  ;;  %994 = vmatprep.mubr.f32.mxu0 %v1413_v28 }
 0x169   : > { %v499_v44 = vpop.xlane.xlu0 %498  ;;  %1387 = vrsqrt.f32 %v613_v27  ;;  %v582_v43 = vmul.f32 0.015625, %v544_v3  ;;  %v659_v1 = vmul.f32 %v1378_v22, %v1775_v12  ;;  %v734_v4 = vadd.f32 %v1871_v32, %v696_v13 }
 0x16a   : > { %v567_v61 = vmul.f32 0.015625, %v499_v44  ;;  %1389 = vrsqrt.f32 %v598_v63  ;;  %1296 = vmatmul.mubr.msk.f32.gmra.mrb[14].mxu1 %vm264_vm0, %v749_v60  ;;  %v712_v6 = vmul.f32 %v1865_v8, %v674_v2 }
 0x16b   : > { %v1380_v24 = vpop.eup %1379  ;;  %v614_v25 = vadd.f32 1e-05, %v582_v43  ;;  %1090 = vmatprep.mubr.f32.mxu1 %v1413_v28  ;;  %v697_v46 = vmul.f32 %v1865_v8, %v659_v1  ;;  %1281 = vmatmul.mubr.msk.f32.gmra.mrb[16].mxu0 %vm264_vm0, %v734_v4 }
 0x16c   : > { %v599_v15 = vadd.f32 1e-05, %v567_v61  ;;  %v1382_v10 = vpop.eup %1381  ;;  %v547_v18 = vpop.xlane.xlu1 %546  ;;  %v750_v12 = vadd.f32 %v1871_v32, %v712_v6  ;;  %v675_v5 = vmul.f32 %v1380_v24, %v1778_v14  ;;  %1000 = vmatprep.mubr.f32.mxu0 %v1413_v28 }
 0x16d   : > { %v502_v23 = vpop.xlane.xlu0 %501  ;;  %1391 = vrsqrt.f32 %v614_v25  ;;  %v583_v17 = vmul.f32 0.015625, %v547_v18  ;;  %v735_v16 = vadd.f32 %v1871_v32, %v697_v46  ;;  %v660_v55 = vmul.f32 %v1382_v10, %v1787_v37 }
 0x16e   : > { %v568_v48 = vmul.f32 0.015625, %v502_v23  ;;  %1393 = vrsqrt.f32 %v599_v15  ;;  %1297 = vmatmul.mubr.msk.f32.gmra.mrb[16].mxu1 %vm264_vm0, %v750_v12  ;;  %v713_v30 = vmul.f32 %v1865_v8, %v675_v5 }
 0x16f   : > { %v1384_v31 = vpop.eup %1383  ;;  %v615_v51 = vadd.f32 1e-05, %v583_v17  ;;  %1096 = vmatprep.mubr.f32.mxu1 %v1413_v28  ;;  %1282 = vmatmul.mubr.msk.f32.gmra.mrb[18].mxu0 %vm264_vm0, %v735_v16  ;;  %v698_v29 = vmul.f32 %v1865_v8, %v660_v55  ;;  %v776_v55 = vlaneseq }
 0x170   : > { %v600_v34 = vadd.f32 1e-05, %v568_v48  ;;  %v1386_v14 = vpop.eup %1385  ;;  %v550_v36 = vpop.xlane.xlu1 %549  ;;  %v751_v26 = vadd.f32 %v1871_v32, %v713_v30  ;;  %v676_v52 = vmul.f32 %v1384_v31, %v1790_v35  ;;  %1006 = vmatprep.mubr.f32.mxu0 %v1413_v28 }
 0x171   : > { %v505_v38 = vpop.xlane.xlu0 %504  ;;  %1395 = vrsqrt.f32 %v615_v51  ;;  %v584_v37 = vmul.f32 0.015625, %v550_v36  ;;  %v661_v54 = vmul.f32 %v1386_v14, %v1801_v47  ;;  %v736_v9 = vadd.f32 %v1871_v32, %v698_v29 }
 0x172   : > { %v569_v42 = vmul.f32 0.015625, %v505_v38  ;;  %1397 = vrsqrt.f32 %v600_v34  ;;  %1298 = vmatmul.mubr.msk.f32.gmra.mrb[18].mxu1 %vm264_vm0, %v751_v26  ;;  %v714_v11 = vmul.f32 %v1865_v8, %v676_v52  ;;  %v777_v30 = vshrl.u32 %v776_v55, 7 }
 0x173   : > { %v1388_v20 = vpop.eup %1387  ;;  %v616_v19 = vadd.f32 1e-05, %v584_v37  ;;  %1102 = vmatprep.mubr.f32.mxu1 %v1413_v28  ;;  %v699_v35 = vmul.f32 %v1865_v8, %v661_v54  ;;  %1283 = vmatmul.mubr.msk.f32.gmra.mrb[20].mxu0 %vm264_vm0, %v736_v9 }
 0x174   : > { %v601_v21 = vadd.f32 1e-05, %v569_v42  ;;  %v1390_v40 = vpop.eup %1389  ;;  %v553_v41 = vpop.xlane.xlu1 %552  ;;  %v752_v47 = vadd.f32 %v1871_v32, %v714_v11  ;;  %v677_v7 = vmul.f32 %v1388_v20, %v1804_v50  ;;  %1012 = vmatprep.mubr.f32.mxu0 %v1413_v28  ;;  %v778_v31 = vsub.s32 0, %v777_v30 }
 0x175   : > { %1399 = vrsqrt.f32 %v616_v19  ;;  %v585_v58 = vmul.f32 0.015625, %v553_v41  ;;  %v737_v56 = vadd.f32 %v1871_v32, %v699_v35  ;;  %v662_v62 = vmul.f32 %v1390_v40, %v1813_v33 }
 0x176   : > { %1401 = vrsqrt.f32 %v601_v21  ;;  %1299 = vmatmul.mubr.msk.f32.gmra.mrb[20].mxu1 %vm264_vm0, %v752_v47  ;;  %v715_v27 = vmul.f32 %v1865_v8, %v677_v7  ;;  %v782_v51 = vsub.s32 1, %v777_v30 }
 0x177   : > { %v1392_v63 = vpop.eup %1391  ;;  %v617_v22 = vadd.f32 1e-05, %v585_v58  ;;  %1108 = vmatprep.mubr.f32.mxu1 %v1413_v28  ;;  %v700_v3 = vmul.f32 %v1865_v8, %v662_v62  ;;  %1284 = vmatmul.mubr.msk.f32.gmra.mrb[22].mxu0 %vm264_vm0, %v737_v56 }
 0x178   : > { %v1394_v50 = vpop.eup %1393  ;;  %v753_v44 = vadd.f32 %v1871_v32, %v715_v27  ;;  %v678_v13 = vmul.f32 %v1392_v63, %v1816_v45  ;;  %1018 = vmatprep.mubr.f32.mxu0 %v1413_v28 }
 0x179   : > { %1403 = vrsqrt.f32 %v617_v22  ;;  %v738_v33 = vadd.f32 %v1871_v32, %v700_v3  ;;  %v663_v60 = vmul.f32 %v1394_v50, %v1825_v0 }
 0x17a   : > { %1300 = vmatmul.mubr.msk.f32.gmra.mrb[22].mxu1 %vm264_vm0, %v753_v44  ;;  %v716_v2 = vmul.f32 %v1865_v8, %v678_v13 }
 0x17b   : > { %v1396_v43 = vpop.eup %1395  ;;  %1114 = vmatprep.mubr.f32.mxu1 %v1413_v28  ;;  %v701_v61 = vmul.f32 %v1865_v8, %v663_v60  ;;  %1285 = vmatmul.mubr.msk.f32.gmra.mrb[24].mxu0 %vm264_vm0, %v738_v33 }
 0x17c   : > { %v1398_v1 = vpop.eup %1397  ;;  %v754_v45 = vadd.f32 %v1871_v32, %v716_v2  ;;  %v679_v4 = vmul.f32 %v1396_v43, %v1828_v49  ;;  %1024 = vmatprep.mubr.f32.mxu0 %v1413_v28 }
 0x17d   : > { %v739_v0 = vadd.f32 %v1871_v32, %v701_v61  ;;  %v664_v6 = vmul.f32 %v1398_v1, %v1837_v39 }
 0x17e   : > { %1301 = vmatmul.mubr.msk.f32.gmra.mrb[24].mxu1 %vm264_vm0, %v754_v45  ;;  %v717_v24 = vmul.f32 %v1865_v8, %v679_v4 }
 0x17f   : > { %v1400_v25 = vpop.eup %1399  ;;  %1120 = vmatprep.mubr.f32.mxu1 %v1413_v28  ;;  %v702_v15 = vmul.f32 %v1865_v8, %v664_v6  ;;  %1286 = vmatmul.mubr.msk.f32.gmra.mrb[26].mxu0 %vm264_vm0, %v739_v0 }
 0x180   : > { %v1402_v46 = vpop.eup %1401  ;;  %v755_v49 = vadd.f32 %v1871_v32, %v717_v24  ;;  %v680_v10 = vmul.f32 %v1400_v25, %v1840_v53  ;;  %1030 = vmatprep.mubr.f32.mxu0 %v1413_v28 }
 0x181   : > { %v740_v39 = vadd.f32 %v1871_v32, %v702_v15  ;;  %v665_v18 = vmul.f32 %v1402_v46, %v1849_v59 }
 0x182   : > { %1302 = vmatmul.mubr.msk.f32.gmra.mrb[26].mxu1 %vm264_vm0, %v755_v49  ;;  %v718_v23 = vmul.f32 %v1865_v8, %v680_v10 }
 0x183   : > { %v1404_v12 = vpop.eup %1403  ;;  %1126 = vmatprep.mubr.f32.mxu1 %v1413_v28  ;;  %v703_v5 = vmul.f32 %v1865_v8, %v665_v18  ;;  %1287 = vmatmul.mubr.msk.f32.gmra.mrb[28].mxu0 %vm264_vm0, %v740_v39 }
 0x184   : > { %v756_v53 = vadd.f32 %v1871_v32, %v718_v23  ;;  %v681_v17 = vmul.f32 %v1404_v12, %v1852_v57  ;;  %1036 = vmatprep.mubr.f32.mxu0 %v1413_v28  ;;  %v774_v57 = vld [vmem:[%s2210_s4] sm:$0x3] }
 0x185   : > { %v741_v59 = vadd.f32 %v1871_v32, %v703_v5  ;;  %v2034_v34 = vrot.slane %v774_v57, %v778_v31 }
 0x186   : > { %1303 = vmatmul.mubr.msk.f32.gmra.mrb[28].mxu1 %vm264_vm0, %v756_v53  ;;  %v719_v48 = vmul.f32 %v1865_v8, %v681_v17  ;;  %v2036_v8 = vrot.slane %v774_v57, %v782_v51 }
 0x187   : > { %1132 = vmatprep.mubr.f32.mxu1 %v1413_v28  ;;  %1288 = vmatmul.mubr.msk.f32.gmra.mrb[30].mxu0 %vm264_vm0, %v741_v59 }
 0x188   : > { %v757_v16 = vadd.f32 %v1871_v32, %v719_v48 }
 0x18a   : > { %1304 = vmatmul.mubr.msk.f32.gmra.mrb[30].mxu1 %vm264_vm0, %v757_v16 }
 0x21d   : > { %v948_v28 = vpop.f32.mrb[0].mxu0 }
 0x21e   : > { %v949_v32 = vadd.f32 %v948_v28, %v2034_v34  ;;  %v950_v14 = vpop.f32.mrb[1].mxu0 }
 0x21f   : > { %v951_v36 = vadd.f32 %v950_v14, %v2036_v8 }
 0x220   : > { %1139 = vst [vmem:[%s2041_s19] sm:$0xff] %v949_v32 }
 0x221   : > { %1140 = vst.msk [vmem:[%s2041_s19 + $0x8] sm:$0xff] %vm264_vm0, %v951_v36  ;;  %v1044_v38 = vpop.f32.mrb[0].mxu1 }
 0x222   : > { %v954_v29 = vpop.f32.mrb[2].mxu0  ;;  %v1045_v26 = vadd.f32 %v1044_v38, %v2034_v34  ;;  %v1046_v52 = vpop.f32.mrb[1].mxu1 }
 0x223   : > { %v955_v37 = vadd.f32 %v954_v29, %v2034_v34  ;;  %v956_v42 = vpop.f32.mrb[3].mxu0  ;;  %v1047_v54 = vadd.f32 %v1046_v52, %v2036_v8 }
 0x224   : > { %1171 = vst [vmem:[%s2041_s19 + $0x100] sm:$0xff] %v1045_v26  ;;  %v957_v9 = vadd.f32 %v956_v42, %v2036_v8 }
 0x225   : > { %1141 = vst [vmem:[%s2041_s19 + $0x10] sm:$0xff] %v955_v37  ;;  %1172 = vst.msk [vmem:[%s2041_s19 + $0x108] sm:$0xff] %vm264_vm0, %v1047_v54  ;;  %v1050_v11 = vpop.f32.mrb[2].mxu1 }
 0x226   : > { %1142 = vst.msk [vmem:[%s2041_s19 + $0x18] sm:$0xff] %vm264_vm0, %v957_v9  ;;  %v1051_v20 = vadd.f32 %v1050_v11, %v2034_v34  ;;  %v1052_v19 = vpop.f32.mrb[3].mxu1  ;;  %v960_v21 = vpop.f32.mrb[4].mxu0 }
 0x227   : > { %v1053_v35 = vadd.f32 %v1052_v19, %v2036_v8  ;;  %v961_v40 = vadd.f32 %v960_v21, %v2034_v34  ;;  %v962_v41 = vpop.f32.mrb[5].mxu0 }
 0x228   : > { %1173 = vst [vmem:[%s2041_s19 + $0x110] sm:$0xff] %v1051_v20  ;;  %v963_v47 = vadd.f32 %v962_v41, %v2036_v8 }
 0x229   : > { %1174 = vst.msk [vmem:[%s2041_s19 + $0x118] sm:$0xff] %vm264_vm0, %v1053_v35  ;;  %v1056_v7 = vpop.f32.mrb[4].mxu1  ;;  %1143 = vst [vmem:[%s2041_s19 + $0x20] sm:$0xff] %v961_v40 }
 0x22a   : > { %v1057_v58 = vadd.f32 %v1056_v7, %v2034_v34  ;;  %v1058_v56 = vpop.f32.mrb[5].mxu1  ;;  %1144 = vst.msk [vmem:[%s2041_s19 + $0x28] sm:$0xff] %vm264_vm0, %v963_v47  ;;  %v966_v62 = vpop.f32.mrb[6].mxu0 }
 0x22b   : > { %v1059_v27 = vadd.f32 %v1058_v56, %v2036_v8  ;;  %v967_v63 = vadd.f32 %v966_v62, %v2034_v34  ;;  %v968_v22 = vpop.f32.mrb[7].mxu0 }
 0x22c   : > { %1175 = vst [vmem:[%s2041_s19 + $0x120] sm:$0xff] %v1057_v58  ;;  %v969_v3 = vadd.f32 %v968_v22, %v2036_v8 }
 0x22d   : > { %1176 = vst.msk [vmem:[%s2041_s19 + $0x128] sm:$0xff] %vm264_vm0, %v1059_v27  ;;  %v1062_v50 = vpop.f32.mrb[6].mxu1  ;;  %1145 = vst [vmem:[%s2041_s19 + $0x30] sm:$0xff] %v967_v63 }
 0x22e   : > { %v1063_v44 = vadd.f32 %v1062_v50, %v2034_v34  ;;  %v1064_v13 = vpop.f32.mrb[7].mxu1  ;;  %1146 = vst.msk [vmem:[%s2041_s19 + $0x38] sm:$0xff] %vm264_vm0, %v969_v3  ;;  %v972_v33 = vpop.f32.mrb[8].mxu0 }
 0x22f   : > { %v1065_v60 = vadd.f32 %v1064_v13, %v2036_v8  ;;  %v973_v2 = vadd.f32 %v972_v33, %v2034_v34  ;;  %v974_v43 = vpop.f32.mrb[9].mxu0 }
 0x230   : > { %1177 = vst [vmem:[%s2041_s19 + $0x130] sm:$0xff] %v1063_v44  ;;  %v975_v61 = vadd.f32 %v974_v43, %v2036_v8 }
 0x231   : > { %1178 = vst.msk [vmem:[%s2041_s19 + $0x138] sm:$0xff] %vm264_vm0, %v1065_v60  ;;  %v1068_v1 = vpop.f32.mrb[8].mxu1  ;;  %1147 = vst [vmem:[%s2041_s19 + $0x40] sm:$0xff] %v973_v2 }
 0x232   : > { %v1069_v45 = vadd.f32 %v1068_v1, %v2034_v34  ;;  %v1070_v4 = vpop.f32.mrb[9].mxu1  ;;  %1148 = vst.msk [vmem:[%s2041_s19 + $0x48] sm:$0xff] %vm264_vm0, %v975_v61  ;;  %v978_v0 = vpop.f32.mrb[10].mxu0 }
 0x233   : > { %v1071_v6 = vadd.f32 %v1070_v4, %v2036_v8  ;;  %v979_v24 = vadd.f32 %v978_v0, %v2034_v34  ;;  %v980_v25 = vpop.f32.mrb[11].mxu0 }
 0x234   : > { %1179 = vst [vmem:[%s2041_s19 + $0x140] sm:$0xff] %v1069_v45  ;;  %v981_v15 = vadd.f32 %v980_v25, %v2036_v8 }
 0x235   : > { %1180 = vst.msk [vmem:[%s2041_s19 + $0x148] sm:$0xff] %vm264_vm0, %v1071_v6  ;;  %v1074_v46 = vpop.f32.mrb[10].mxu1  ;;  %1149 = vst [vmem:[%s2041_s19 + $0x50] sm:$0xff] %v979_v24 }
 0x236   : > { %v1075_v49 = vadd.f32 %v1074_v46, %v2034_v34  ;;  %v1076_v10 = vpop.f32.mrb[11].mxu1  ;;  %1150 = vst.msk [vmem:[%s2041_s19 + $0x58] sm:$0xff] %vm264_vm0, %v981_v15  ;;  %v984_v39 = vpop.f32.mrb[12].mxu0 }
 0x237   : > { %v1077_v18 = vadd.f32 %v1076_v10, %v2036_v8  ;;  %v985_v23 = vadd.f32 %v984_v39, %v2034_v34  ;;  %v986_v12 = vpop.f32.mrb[13].mxu0 }
 0x238   : > { %1181 = vst [vmem:[%s2041_s19 + $0x150] sm:$0xff] %v1075_v49  ;;  %v987_v5 = vadd.f32 %v986_v12, %v2036_v8 }
 0x239   : > { %1182 = vst.msk [vmem:[%s2041_s19 + $0x158] sm:$0xff] %vm264_vm0, %v1077_v18  ;;  %v1080_v53 = vpop.f32.mrb[12].mxu1  ;;  %1151 = vst [vmem:[%s2041_s19 + $0x60] sm:$0xff] %v985_v23 }
 0x23a   : > { %v1081_v17 = vadd.f32 %v1080_v53, %v2034_v34  ;;  %v1082_v59 = vpop.f32.mrb[13].mxu1  ;;  %1152 = vst.msk [vmem:[%s2041_s19 + $0x68] sm:$0xff] %vm264_vm0, %v987_v5  ;;  %v990_v48 = vpop.f32.mrb[14].mxu0 }
 0x23b   : > { %v1083_v16 = vadd.f32 %v1082_v59, %v2036_v8  ;;  %v991_v55 = vadd.f32 %v990_v48, %v2034_v34  ;;  %v992_v30 = vpop.f32.mrb[15].mxu0 }
 0x23c   : > { %1183 = vst [vmem:[%s2041_s19 + $0x160] sm:$0xff] %v1081_v17  ;;  %v993_v31 = vadd.f32 %v992_v30, %v2036_v8 }
 0x23d   : > { %1184 = vst.msk [vmem:[%s2041_s19 + $0x168] sm:$0xff] %vm264_vm0, %v1083_v16  ;;  %v1086_v57 = vpop.f32.mrb[14].mxu1  ;;  %1153 = vst [vmem:[%s2041_s19 + $0x70] sm:$0xff] %v991_v55 }
 0x23e   : > { %v1087_v51 = vadd.f32 %v1086_v57, %v2034_v34  ;;  %v1088_v28 = vpop.f32.mrb[15].mxu1  ;;  %1154 = vst.msk [vmem:[%s2041_s19 + $0x78] sm:$0xff] %vm264_vm0, %v993_v31  ;;  %v996_v32 = vpop.f32.mrb[16].mxu0 }
 0x23f   : > { %v1089_v14 = vadd.f32 %v1088_v28, %v2036_v8  ;;  %v997_v36 = vadd.f32 %v996_v32, %v2034_v34  ;;  %v998_v38 = vpop.f32.mrb[17].mxu0 }
 0x240   : > { %1185 = vst [vmem:[%s2041_s19 + $0x170] sm:$0xff] %v1087_v51  ;;  %v999_v29 = vadd.f32 %v998_v38, %v2036_v8 }
 0x241   : > { %1186 = vst.msk [vmem:[%s2041_s19 + $0x178] sm:$0xff] %vm264_vm0, %v1089_v14  ;;  %v1092_v26 = vpop.f32.mrb[16].mxu1  ;;  %1155 = vst [vmem:[%s2041_s19 + $0x80] sm:$0xff] %v997_v36 }
 0x242   : > { %v1093_v52 = vadd.f32 %v1092_v26, %v2034_v34  ;;  %v1094_v37 = vpop.f32.mrb[17].mxu1  ;;  %1156 = vst.msk [vmem:[%s2041_s19 + $0x88] sm:$0xff] %vm264_vm0, %v999_v29  ;;  %v1002_v42 = vpop.f32.mrb[18].mxu0 }
 0x243   : > { %v1095_v54 = vadd.f32 %v1094_v37, %v2036_v8  ;;  %v1003_v9 = vadd.f32 %v1002_v42, %v2034_v34  ;;  %v1004_v11 = vpop.f32.mrb[19].mxu0 }
 0x244   : > { %1187 = vst [vmem:[%s2041_s19 + $0x180] sm:$0xff] %v1093_v52  ;;  %v1005_v20 = vadd.f32 %v1004_v11, %v2036_v8 }
 0x245   : > { %1188 = vst.msk [vmem:[%s2041_s19 + $0x188] sm:$0xff] %vm264_vm0, %v1095_v54  ;;  %v1098_v19 = vpop.f32.mrb[18].mxu1  ;;  %1157 = vst [vmem:[%s2041_s19 + $0x90] sm:$0xff] %v1003_v9 }
 0x246   : > { %v1099_v21 = vadd.f32 %v1098_v19, %v2034_v34  ;;  %v1100_v35 = vpop.f32.mrb[19].mxu1  ;;  %1158 = vst.msk [vmem:[%s2041_s19 + $0x98] sm:$0xff] %vm264_vm0, %v1005_v20  ;;  %v1008_v40 = vpop.f32.mrb[20].mxu0 }
 0x247   : > { %v1101_v41 = vadd.f32 %v1100_v35, %v2036_v8  ;;  %v1009_v47 = vadd.f32 %v1008_v40, %v2034_v34  ;;  %v1010_v7 = vpop.f32.mrb[21].mxu0 }
 0x248   : > { %1189 = vst [vmem:[%s2041_s19 + $0x190] sm:$0xff] %v1099_v21  ;;  %v1011_v58 = vadd.f32 %v1010_v7, %v2036_v8 }
 0x249   : > { %1190 = vst.msk [vmem:[%s2041_s19 + $0x198] sm:$0xff] %vm264_vm0, %v1101_v41  ;;  %v1104_v56 = vpop.f32.mrb[20].mxu1  ;;  %1159 = vst [vmem:[%s2041_s19 + $0xa0] sm:$0xff] %v1009_v47 }
 0x24a   : > { %v1105_v62 = vadd.f32 %v1104_v56, %v2034_v34  ;;  %v1106_v27 = vpop.f32.mrb[21].mxu1  ;;  %1160 = vst.msk [vmem:[%s2041_s19 + $0xa8] sm:$0xff] %vm264_vm0, %v1011_v58  ;;  %v1014_v63 = vpop.f32.mrb[22].mxu0 }
 0x24b   : > { %v1107_v22 = vadd.f32 %v1106_v27, %v2036_v8  ;;  %v1015_v3 = vadd.f32 %v1014_v63, %v2034_v34  ;;  %v1016_v50 = vpop.f32.mrb[23].mxu0 }
 0x24c   : > { %1191 = vst [vmem:[%s2041_s19 + $0x1a0] sm:$0xff] %v1105_v62  ;;  %v1017_v44 = vadd.f32 %v1016_v50, %v2036_v8 }
 0x24d   : > { %1192 = vst.msk [vmem:[%s2041_s19 + $0x1a8] sm:$0xff] %vm264_vm0, %v1107_v22  ;;  %v1110_v13 = vpop.f32.mrb[22].mxu1  ;;  %1161 = vst [vmem:[%s2041_s19 + $0xb0] sm:$0xff] %v1015_v3 }
 0x24e   : > { %v1111_v33 = vadd.f32 %v1110_v13, %v2034_v34  ;;  %v1112_v60 = vpop.f32.mrb[23].mxu1  ;;  %1162 = vst.msk [vmem:[%s2041_s19 + $0xb8] sm:$0xff] %vm264_vm0, %v1017_v44  ;;  %v1020_v2 = vpop.f32.mrb[24].mxu0 }
 0x24f   : > { %v1113_v43 = vadd.f32 %v1112_v60, %v2036_v8  ;;  %v1021_v61 = vadd.f32 %v1020_v2, %v2034_v34  ;;  %v1022_v1 = vpop.f32.mrb[25].mxu0 }
 0x250   : > { %1193 = vst [vmem:[%s2041_s19 + $0x1b0] sm:$0xff] %v1111_v33  ;;  %v1023_v45 = vadd.f32 %v1022_v1, %v2036_v8 }
 0x251   : > { %1194 = vst.msk [vmem:[%s2041_s19 + $0x1b8] sm:$0xff] %vm264_vm0, %v1113_v43  ;;  %v1116_v4 = vpop.f32.mrb[24].mxu1  ;;  %1163 = vst [vmem:[%s2041_s19 + $0xc0] sm:$0xff] %v1021_v61 }
 0x252   : > { %v1117_v0 = vadd.f32 %v1116_v4, %v2034_v34  ;;  %v1118_v6 = vpop.f32.mrb[25].mxu1  ;;  %1164 = vst.msk [vmem:[%s2041_s19 + $0xc8] sm:$0xff] %vm264_vm0, %v1023_v45  ;;  %v1026_v24 = vpop.f32.mrb[26].mxu0 }
 0x253   : > { %v1119_v25 = vadd.f32 %v1118_v6, %v2036_v8  ;;  %v1027_v15 = vadd.f32 %v1026_v24, %v2034_v34  ;;  %v1028_v46 = vpop.f32.mrb[27].mxu0 }
 0x254   : > { %1195 = vst [vmem:[%s2041_s19 + $0x1c0] sm:$0xff] %v1117_v0  ;;  %v1029_v49 = vadd.f32 %v1028_v46, %v2036_v8 }
 0x255   : > { %1196 = vst.msk [vmem:[%s2041_s19 + $0x1c8] sm:$0xff] %vm264_vm0, %v1119_v25  ;;  %v1122_v10 = vpop.f32.mrb[26].mxu1  ;;  %1165 = vst [vmem:[%s2041_s19 + $0xd0] sm:$0xff] %v1027_v15 }
 0x256   : > { %v1123_v39 = vadd.f32 %v1122_v10, %v2034_v34  ;;  %v1124_v18 = vpop.f32.mrb[27].mxu1  ;;  %1166 = vst.msk [vmem:[%s2041_s19 + $0xd8] sm:$0xff] %vm264_vm0, %v1029_v49  ;;  %v1032_v23 = vpop.f32.mrb[28].mxu0 }
 0x257   : > { %v1125_v12 = vadd.f32 %v1124_v18, %v2036_v8  ;;  %v1033_v5 = vadd.f32 %v1032_v23, %v2034_v34  ;;  %v1034_v53 = vpop.f32.mrb[29].mxu0 }
 0x258   : > { %1197 = vst [vmem:[%s2041_s19 + $0x1d0] sm:$0xff] %v1123_v39  ;;  %v1035_v17 = vadd.f32 %v1034_v53, %v2036_v8 }
 0x259   : > { %1198 = vst.msk [vmem:[%s2041_s19 + $0x1d8] sm:$0xff] %vm264_vm0, %v1125_v12  ;;  %v1128_v59 = vpop.f32.mrb[28].mxu1  ;;  %1167 = vst [vmem:[%s2041_s19 + $0xe0] sm:$0xff] %v1033_v5 }
 0x25a   : > { %v1129_v48 = vadd.f32 %v1128_v59, %v2034_v34  ;;  %v1130_v16 = vpop.f32.mrb[29].mxu1  ;;  %1168 = vst.msk [vmem:[%s2041_s19 + $0xe8] sm:$0xff] %vm264_vm0, %v1035_v17  ;;  %v1038_v55 = vpop.f32.mrb[30].mxu0 }
 0x25b   : > { %v1131_v30 = vadd.f32 %v1130_v16, %v2036_v8  ;;  %v1039_v31 = vadd.f32 %v1038_v55, %v2034_v34  ;;  %v1040_v57 = vpop.f32.mrb[31].mxu0 }
 0x25c   : > { %1199 = vst [vmem:[%s2041_s19 + $0x1e0] sm:$0xff] %v1129_v48  ;;  %v1041_v51 = vadd.f32 %v1040_v57, %v2036_v8 }
 0x25d   : > { %1200 = vst.msk [vmem:[%s2041_s19 + $0x1e8] sm:$0xff] %vm264_vm0, %v1131_v30  ;;  %v1134_v28 = vpop.f32.mrb[30].mxu1  ;;  %1169 = vst [vmem:[%s2041_s19 + $0xf0] sm:$0xff] %v1039_v31 }
 0x25e   : > { %v1135_v32 = vadd.f32 %v1134_v28, %v2034_v34  ;;  %v1136_v14 = vpop.f32.mrb[31].mxu1  ;;  %1170 = vst.msk [vmem:[%s2041_s19 + $0xf8] sm:$0xff] %vm264_vm0, %v1041_v51 }
 0x25f   : > { %v1137_v36 = vadd.f32 %v1136_v14, %v2036_v8 }
 0x260   : > { %1201 = vst [vmem:[%s2041_s19 + $0x1f0] sm:$0xff] %v1135_v32 }
 0x261   : > { %1202 = vst.msk [vmem:[%s2041_s19 + $0x1f8] sm:$0xff] %vm264_vm0, %v1137_v36 }
 0x262 PF: > { %s15_s18 = sadd.s32 1, %s1411_s18  }
 0x263   : > { %p12_p4 = scmp.ge.s32.totalorder %s15_s18, 4  }
 0x265   :  { %14 = sbr.rel (!%p12_p4) target bundleno = 1 (0x1), region = 70 }

</bundles_post_ra>
